<compile_context>
chip_gen: v7x
topology: tpu7x:2x2x1
jax: 0.10.0
libtpu: 0.0.40
codegen_flags: <defaults>
</compile_context>

<pallas_src>
import math
import functools

import jax
import jax.numpy as jnp
from jax import lax
from jax.experimental import pallas as pl
from jax.experimental.pallas import tpu as pltpu
from jax.scipy.special import gammaln

STD2 = 0.1
VAR2 = STD2 * STD2
LOG_VAR2 = math.log(VAR2)


def _round_up(x, m):
    return (x + m - 1) // m * m


# ----------------------------------------------------------------------------
# Fused kernel: VAE encode/decode + VAE loss + context encoder + softmax scores
#               + cumsum + multinomial sampling loop, single lane-dense output.
# Gridless single-block kernel: every operand fits in VMEM at these sizes.
# (If N_q / N_l ever grow, add a "parallel" grid over queries for v7x megacore.)
# ----------------------------------------------------------------------------
def llm_router_kernel(llms_ref, eps_ref, contexts_ref, rand_ref, agent_int_ref,
                      w1_ref, b1_ref, w2_ref, b2_ref, w3_ref, b3_ref,
                      w4_ref, b4_ref, wc_ref, bc_ref,
                      packed_ref,
                      *, max_agent, n_llm, hidden, temp, pack_width):
    f32 = jnp.float32

    # ------------------------- VAE encoder / decoder + loss -----------------
    x = llms_ref[...]                                                   # [N_l, D]
    h = jnp.maximum(
        jnp.dot(x, w1_ref[...], preferred_element_type=f32) + b1_ref[...], 0.0)

    # fused fc21 | fc22: one [H, 2H] matmul, then slice mu / log_var.
    mulv = jnp.dot(h, w2_ref[...], preferred_element_type=f32) + b2_ref[...]
    mu = mulv[:, :hidden]
    log_var = mulv[:, hidden:]

    # reparameterize: z = mu + eps * exp(0.5*log_var) * std2
    std = jnp.exp(0.5 * log_var) * STD2
    z = mu + eps_ref[...] * std                                         # [N_l, H]

    # decode
    h2 = jnp.maximum(
        jnp.dot(z, w3_ref[...], preferred_element_type=f32) + b3_ref[...], 0.0)
    x_hat = jnp.dot(h2, w4_ref[...], preferred_element_type=f32) + b4_ref[...]

    # vae_loss_function: MSE(mean) + KLD(mean)
    mse = jnp.mean((x_hat - x) ** 2, keepdims=True)                     # [1, 1]
    kld = -0.5 * jnp.mean(
        1.0 - LOG_VAR2 + log_var - (mu * mu + jnp.exp(log_var)) / VAR2,
        keepdims=True)                                                  # [1, 1]
    vae_loss = mse + kld                                                # [1, 1]

    # ------------------------- router ----------------------------------------
    # L2 normalize via rsqrt (EUP slot instead of vector divide).
    llm_emb = z * lax.rsqrt(
        jnp.maximum(jnp.sum(z * z, axis=1, keepdims=True), 1e-24))      # [N_l, H]
    c = jnp.dot(contexts_ref[...], wc_ref[...],
                preferred_element_type=f32) + bc_ref[...]               # [N_q, H]
    ctx_emb = c * lax.rsqrt(
        jnp.maximum(jnp.sum(c * c, axis=1, keepdims=True), 1e-24))

    # scores = softmax(ctx_emb @ llm_emb.T / temp, dim=1)
    logits = lax.dot_general(ctx_emb, llm_emb, (((1,), (1,)), ((), ())),
                             preferred_element_type=f32) / temp         # [N_q, N_l]
    logits = logits - jnp.max(logits, axis=1, keepdims=True)
    e = jnp.exp(logits)
    scores = e * pl.reciprocal(jnp.sum(e, axis=1, keepdims=True), approx=True)

    n_q = scores.shape[0]

    # cumsum along the llm axis via a tiny upper-triangular matmul.
    # TODO(synk): if n_llm ever exceeds a vreg row (>128), replace with a
    # lane-axis scan or pass tri in as a constant input instead of iotas.
    k_iota = lax.broadcasted_iota(jnp.int32, (n_llm, n_llm), 0)
    j_iota = lax.broadcasted_iota(jnp.int32, (n_llm, n_llm), 1)
    tri = (k_iota <= j_iota).astype(f32)
    cumsum = jnp.dot(scores, tri, preferred_element_type=f32)           # [N_q, N_l]

    lane = lax.broadcasted_iota(jnp.int32, (n_q, n_llm), 1)
    agent_int = agent_int_ref[...]                                      # [N_q, 1] i32
    rand = rand_ref[...]                                                # [N_q, max_agent]

    selected = jnp.zeros((n_q, n_llm), f32)
    idx_cols = []
    # sampling loop over agents (static, unrolled trip count)
    for i in range(1, max_agent + 1):
        active = agent_int >= i                                         # [N_q, 1] bool
        r = rand[:, i - 1:i]                                            # [N_q, 1]
        # inverse-CDF sample: first j with cumsum[j] > r  ==  #(cumsum <= r)
        idx = jnp.sum((cumsum <= r).astype(jnp.int32), axis=1, keepdims=True)
        idx = jnp.minimum(idx, n_llm - 1)                               # rounding clamp
        onehot = (lane == idx).astype(f32)                              # [N_q, N_l]
        selected = selected + onehot * active.astype(f32)
        idx_cols.append(jnp.where(active, idx, -1).astype(f32))         # -1 = inactive

    # sum_j selected[i,j] * log(scores[i,j]) with a 0*log(0) guard.
    safe_log = jnp.where(selected > 0.0, jnp.log(scores), 0.0)
    slog = jnp.sum(selected * safe_log, axis=1, keepdims=True)          # [N_q, 1]

    loss_col = jnp.broadcast_to(vae_loss, (n_q, 1))                     # [N_q, 1]

    # Single lane-dense store: [scores | selected | sel_idx | slog | loss | 0...]
    used = 2 * n_llm + max_agent + 2
    packed = jnp.concatenate(
        [scores, selected] + idx_cols + [slog, loss_col,
         jnp.zeros((n_q, pack_width - used), f32)], axis=1)             # [N_q, pack_width]
    packed_ref[...] = packed


# ----------------------------------------------------------------------------
# Wrapper
# ----------------------------------------------------------------------------
def init_params(key, input_dim, context_input_dim, hidden_dim):
    ks = jax.random.split(key, 12)
    n = lambda k, shape: jax.random.normal(k, shape, jnp.float32) * 0.05
    return dict(
        w1=n(ks[0], (input_dim, hidden_dim)),   b1=n(ks[1], (1, hidden_dim)),
        w21=n(ks[2], (hidden_dim, hidden_dim)), b21=n(ks[3], (1, hidden_dim)),
        w22=n(ks[4], (hidden_dim, hidden_dim)), b22=n(ks[5], (1, hidden_dim)),
        w3=n(ks[6], (hidden_dim, hidden_dim)),  b3=n(ks[7], (1, hidden_dim)),
        w4=n(ks[8], (hidden_dim, input_dim)),   b4=n(ks[9], (1, input_dim)),
        wc=n(ks[10], (context_input_dim, hidden_dim)), bc=n(ks[11], (1, hidden_dim)),
    )


@functools.partial(jax.jit, static_argnames=("temp", "max_agent"))
def llm_router_forward(llms, contexts, agent_num_int, agent_num_float,
                       params, key, *, temp=1.0, max_agent=6):
    n_l, _ = llms.shape
    n_q, _ = contexts.shape
    hidden = params["w21"].shape[1]

    k_eps, k_rand = jax.random.split(key)
    eps = jax.random.normal(k_eps, (n_l, hidden), jnp.float32)          # randn_like(std)
    rand = jax.random.uniform(k_rand, (n_q, max_agent), jnp.float32)    # rand_like per round

    # fuse fc21 | fc22 into one [H, 2H] weight -> single MXU push in-kernel.
    w2 = jnp.concatenate([params["w21"], params["w22"]], axis=1)
    b2 = jnp.concatenate([params["b21"], params["b22"]], axis=1)

    used = 2 * n_l + max_agent + 2
    pack_width = max(128, _round_up(used, 128))

    vmem = pl.BlockSpec(memory_space=pltpu.MemorySpace.VMEM)
    kernel = functools.partial(
        llm_router_kernel, max_agent=max_agent, n_llm=n_l, hidden=hidden,
        temp=float(temp), pack_width=pack_width)

    packed = pl.pallas_call(
        kernel,
        out_shape=jax.ShapeDtypeStruct((n_q, pack_width), jnp.float32),
        in_specs=[vmem] * 15,
        out_specs=vmem,
    )(llms, eps, contexts, rand, agent_num_int,
      params["w1"], params["b1"], w2, b2,
      params["w3"], params["b3"], params["w4"], params["b4"],
      params["wc"], params["bc"])

    scores = packed[:, :n_l]
    selected_llm = packed[:, n_l:2 * n_l]
    sel_idx = packed[:, 2 * n_l:2 * n_l + max_agent].astype(jnp.int32)  # -1 = inactive
    slog = packed[:, 2 * n_l + max_agent:2 * n_l + max_agent + 1]
    vae_loss = packed[0, 2 * n_l + max_agent + 1]

    # gammaln (lgamma) has no Mosaic lowering; tiny XLA glue outside the kernel.
    log_probs = (gammaln(agent_num_float + 1.0)
                 - jnp.sum(gammaln(selected_llm + 1.0), axis=1, keepdims=True)
                 + slog)

    return sel_idx, selected_llm, scores, log_probs, vae_loss


def build_selected_llm_index(sel_idx, agent_num_int, max_agent):
    # Host-side reconstruction of the Python List[List[int]] output.
    sel_idx = jax.device_get(sel_idx)
    agent_num_int = jax.device_get(agent_num_int)
    n_q = agent_num_int.shape[0]
    out = [[] for _ in range(n_q)]
    for i in range(1, max_agent + 1):
        for j in range(n_q):
            if int(agent_num_int[j, 0]) >= i:
                out[j].append(int(sel_idx[j, i - 1]))
    return out


if __name__ == "__main__":
    # Module-default dims (still tiny): llms [N_l, 384], contexts [N_q, 192].
    input_dim, context_input_dim, hidden_dim = 384, 192, 64
    n_llm, n_query, max_agent, temp = 4, 2, 6, 1.0

    root = jax.random.PRNGKey(0)
    k_param, k_llm, k_ctx, k_fwd = jax.random.split(root, 4)

    params = init_params(k_param, input_dim, context_input_dim, hidden_dim)
    llms = jax.random.normal(k_llm, (n_llm, input_dim), jnp.float32)
    contexts = jax.random.normal(k_ctx, (n_query, context_input_dim), jnp.float32)
    agent_num_int = jnp.array([[2], [4]], dtype=jnp.int32)
    agent_num_float = agent_num_int.astype(jnp.float32)

    sel_idx, selected_llm, scores, log_probs, vae_loss = llm_router_forward(
        llms, contexts, agent_num_int, agent_num_float, params, k_fwd,
        temp=temp, max_agent=max_agent)

    jax.block_until_ready((sel_idx, selected_llm, scores, log_probs, vae_loss))
    selected_llm_index = build_selected_llm_index(sel_idx, agent_num_int, max_agent)

    assert len(selected_llm_index) == n_query
    assert all(len(row) == int(agent_num_int[j, 0])
               for j, row in enumerate(selected_llm_index))
    assert scores.shape == (n_query, n_llm)
    assert selected_llm.shape == (n_query, n_llm)
    assert log_probs.shape == (n_query, 1)
    assert bool(jnp.all(jnp.isfinite(log_probs)))
    assert bool(jnp.isfinite(vae_loss))
    # per query, selected counts must sum to the requested number of agents
    assert bool(jnp.all(jnp.sum(selected_llm, axis=1, keepdims=True)
                        == agent_num_float))
    print("KERNEL_OK")
</pallas_src>

<mosaic_0001>
module attributes {stable_mosaic.version = 11 : i64} {
  func.func @llm_router_kernel(%arg0: memref<4x384xf32, #tpu.memory_space<vmem>>, %arg1: memref<4x64xf32, #tpu.memory_space<vmem>>, %arg2: memref<2x192xf32, #tpu.memory_space<vmem>>, %arg3: memref<2x6xf32, #tpu.memory_space<vmem>>, %arg4: memref<2x1xi32, #tpu.memory_space<vmem>>, %arg5: memref<384x64xf32, #tpu.memory_space<vmem>>, %arg6: memref<1x64xf32, #tpu.memory_space<vmem>>, %arg7: memref<64x128xf32, #tpu.memory_space<vmem>>, %arg8: memref<1x128xf32, #tpu.memory_space<vmem>>, %arg9: memref<64x64xf32, #tpu.memory_space<vmem>>, %arg10: memref<1x64xf32, #tpu.memory_space<vmem>>, %arg11: memref<64x384xf32, #tpu.memory_space<vmem>>, %arg12: memref<1x384xf32, #tpu.memory_space<vmem>>, %arg13: memref<192x64xf32, #tpu.memory_space<vmem>>, %arg14: memref<1x64xf32, #tpu.memory_space<vmem>>, %arg15: memref<2x128xf32, #tpu.memory_space<vmem>>) attributes {dimension_semantics = [], scalar_prefetch = 0 : i64, scratch_operands = 0 : i64, tpu.core_type = #tpu.core_type<tc>} {
    %c0 = arith.constant 0 : index
    %c0_0 = arith.constant 0 : index
    %0 = vector.load %arg0[%c0, %c0_0] : memref<4x384xf32, #tpu.memory_space<vmem>>, vector<4x384xf32>
    %c0_1 = arith.constant 0 : index
    %c0_2 = arith.constant 0 : index
    %1 = vector.load %arg5[%c0_1, %c0_2] : memref<384x64xf32, #tpu.memory_space<vmem>>, vector<384x64xf32>
    %cst = arith.constant dense<0.000000e+00> : vector<4x64xf32>
    %2 = tpu.matmul %0, %1, %cst {dimension_numbers = #tpu.dot_dimension_numbers<[1], [0], [0], [1], [0, 0, 1, 1], [], []>} : vector<4x384xf32>, vector<384x64xf32>, vector<4x64xf32> -> vector<4x64xf32>
    %c0_3 = arith.constant 0 : index
    %c0_4 = arith.constant 0 : index
    %3 = vector.load %arg6[%c0_3, %c0_4] : memref<1x64xf32, #tpu.memory_space<vmem>>, vector<1x64xf32>
    %4 = vector.broadcast %3 : vector<1x64xf32> to vector<4x64xf32>
    %5 = arith.addf %2, %4 : vector<4x64xf32>
    %cst_5 = arith.constant 0.000000e+00 : f32
    %6 = vector.broadcast %cst_5 : f32 to vector<4x64xf32>
    %7 = arith.maximumf %5, %6 : vector<4x64xf32>
    %c0_6 = arith.constant 0 : index
    %c0_7 = arith.constant 0 : index
    %8 = vector.load %arg7[%c0_6, %c0_7] : memref<64x128xf32, #tpu.memory_space<vmem>>, vector<64x128xf32>
    %cst_8 = arith.constant dense<0.000000e+00> : vector<4x128xf32>
    %9 = tpu.matmul %7, %8, %cst_8 {dimension_numbers = #tpu.dot_dimension_numbers<[1], [0], [0], [1], [0, 0, 1, 1], [], []>} : vector<4x64xf32>, vector<64x128xf32>, vector<4x128xf32> -> vector<4x128xf32>
    %c0_9 = arith.constant 0 : index
    %c0_10 = arith.constant 0 : index
    %10 = vector.load %arg8[%c0_9, %c0_10] : memref<1x128xf32, #tpu.memory_space<vmem>>, vector<1x128xf32>
    %11 = vector.broadcast %10 : vector<1x128xf32> to vector<4x128xf32>
    %12 = arith.addf %9, %11 : vector<4x128xf32>
    %13 = vector.extract_strided_slice %12 {offsets = [0, 0], sizes = [4, 64], strides = [1, 1]} : vector<4x128xf32> to vector<4x64xf32>
    %14 = vector.extract_strided_slice %12 {offsets = [0, 64], sizes = [4, 64], strides = [1, 1]} : vector<4x128xf32> to vector<4x64xf32>
    %cst_11 = arith.constant 5.000000e-01 : f32
    %15 = vector.broadcast %cst_11 : f32 to vector<4x64xf32>
    %16 = arith.mulf %15, %14 : vector<4x64xf32>
    %17 = math.exp %16 : vector<4x64xf32>
    %cst_12 = arith.constant 1.000000e-01 : f32
    %18 = vector.broadcast %cst_12 : f32 to vector<4x64xf32>
    %19 = arith.mulf %17, %18 : vector<4x64xf32>
    %c0_13 = arith.constant 0 : index
    %c0_14 = arith.constant 0 : index
    %20 = vector.load %arg1[%c0_13, %c0_14] : memref<4x64xf32, #tpu.memory_space<vmem>>, vector<4x64xf32>
    %21 = arith.mulf %20, %19 : vector<4x64xf32>
    %22 = arith.addf %13, %21 : vector<4x64xf32>
    %c0_15 = arith.constant 0 : index
    %c0_16 = arith.constant 0 : index
    %23 = vector.load %arg9[%c0_15, %c0_16] : memref<64x64xf32, #tpu.memory_space<vmem>>, vector<64x64xf32>
    %cst_17 = arith.constant dense<0.000000e+00> : vector<4x64xf32>
    %24 = tpu.matmul %22, %23, %cst_17 {dimension_numbers = #tpu.dot_dimension_numbers<[1], [0], [0], [1], [0, 0, 1, 1], [], []>} : vector<4x64xf32>, vector<64x64xf32>, vector<4x64xf32> -> vector<4x64xf32>
    %c0_18 = arith.constant 0 : index
    %c0_19 = arith.constant 0 : index
    %25 = vector.load %arg10[%c0_18, %c0_19] : memref<1x64xf32, #tpu.memory_space<vmem>>, vector<1x64xf32>
    %26 = vector.broadcast %25 : vector<1x64xf32> to vector<4x64xf32>
    %27 = arith.addf %24, %26 : vector<4x64xf32>
    %cst_20 = arith.constant 0.000000e+00 : f32
    %28 = vector.broadcast %cst_20 : f32 to vector<4x64xf32>
    %29 = arith.maximumf %27, %28 : vector<4x64xf32>
    %c0_21 = arith.constant 0 : index
    %c0_22 = arith.constant 0 : index
    %30 = vector.load %arg11[%c0_21, %c0_22] : memref<64x384xf32, #tpu.memory_space<vmem>>, vector<64x384xf32>
    %cst_23 = arith.constant dense<0.000000e+00> : vector<4x384xf32>
    %31 = tpu.matmul %29, %30, %cst_23 {dimension_numbers = #tpu.dot_dimension_numbers<[1], [0], [0], [1], [0, 0, 1, 1], [], []>} : vector<4x64xf32>, vector<64x384xf32>, vector<4x384xf32> -> vector<4x384xf32>
    %c0_24 = arith.constant 0 : index
    %c0_25 = arith.constant 0 : index
    %32 = vector.load %arg12[%c0_24, %c0_25] : memref<1x384xf32, #tpu.memory_space<vmem>>, vector<1x384xf32>
    %33 = vector.broadcast %32 : vector<1x384xf32> to vector<4x384xf32>
    %34 = arith.addf %31, %33 : vector<4x384xf32>
    %35 = arith.subf %34, %0 : vector<4x384xf32>
    %36 = arith.mulf %35, %35 : vector<4x384xf32>
    %37 = vector.shape_cast %36 : vector<4x384xf32> to vector<1x4x384xf32>
    %cst_26 = arith.constant dense<0.000000e+00> : vector<1xf32>
    %38 = vector.multi_reduction <add>, %37, %cst_26 [1, 2] : vector<1x4x384xf32> to vector<1xf32>
    %39 = vector.shape_cast %38 : vector<1xf32> to vector<1x1x1xf32>
    %40 = vector.extract %39[0, 0, 0] : f32 from vector<1x1x1xf32>
    %41 = vector.broadcast %40 : f32 to vector<1x1xf32>
    %cst_27 = arith.constant 1.536000e+03 : f32
    %42 = vector.broadcast %cst_27 : f32 to vector<1x1xf32>
    %43 = arith.divf %41, %42 : vector<1x1xf32>
    %cst_28 = arith.constant 5.60517025 : f32
    %44 = vector.broadcast %cst_28 : f32 to vector<4x64xf32>
    %45 = arith.addf %44, %14 : vector<4x64xf32>
    %46 = arith.mulf %13, %13 : vector<4x64xf32>
    %47 = math.exp %14 : vector<4x64xf32>
    %48 = arith.addf %46, %47 : vector<4x64xf32>
    %cst_29 = arith.constant 0.00999999977 : f32
    %49 = vector.broadcast %cst_29 : f32 to vector<4x64xf32>
    %50 = arith.divf %48, %49 : vector<4x64xf32>
    %51 = arith.subf %45, %50 : vector<4x64xf32>
    %52 = vector.shape_cast %51 : vector<4x64xf32> to vector<1x4x64xf32>
    %cst_30 = arith.constant dense<0.000000e+00> : vector<1xf32>
    %53 = vector.multi_reduction <add>, %52, %cst_30 [1, 2] : vector<1x4x64xf32> to vector<1xf32>
    %54 = vector.shape_cast %53 : vector<1xf32> to vector<1x1x1xf32>
    %55 = vector.extract %54[0, 0, 0] : f32 from vector<1x1x1xf32>
    %56 = vector.broadcast %55 : f32 to vector<1x1xf32>
    %cst_31 = arith.constant 2.560000e+02 : f32
    %57 = vector.broadcast %cst_31 : f32 to vector<1x1xf32>
    %58 = arith.divf %56, %57 : vector<1x1xf32>
    %cst_32 = arith.constant -5.000000e-01 : f32
    %59 = vector.broadcast %cst_32 : f32 to vector<1x1xf32>
    %60 = arith.mulf %59, %58 : vector<1x1xf32>
    %61 = arith.addf %43, %60 : vector<1x1xf32>
    %62 = arith.mulf %22, %22 : vector<4x64xf32>
    %cst_33 = arith.constant dense<0.000000e+00> : vector<4xf32>
    %63 = vector.multi_reduction <add>, %62, %cst_33 [1] : vector<4x64xf32> to vector<4xf32>
    %64 = vector.shape_cast %63 : vector<4xf32> to vector<4x1xf32>
    %cst_34 = arith.constant 1.000000e-24 : f32
    %65 = vector.broadcast %cst_34 : f32 to vector<4x1xf32>
    %66 = arith.maximumf %64, %65 : vector<4x1xf32>
    %67 = math.rsqrt %66 : vector<4x1xf32>
    %68 = vector.broadcast %67 : vector<4x1xf32> to vector<4x64xf32>
    %69 = arith.mulf %22, %68 : vector<4x64xf32>
    %c0_35 = arith.constant 0 : index
    %c0_36 = arith.constant 0 : index
    %70 = vector.load %arg2[%c0_35, %c0_36] : memref<2x192xf32, #tpu.memory_space<vmem>>, vector<2x192xf32>
    %c0_37 = arith.constant 0 : index
    %c0_38 = arith.constant 0 : index
    %71 = vector.load %arg13[%c0_37, %c0_38] : memref<192x64xf32, #tpu.memory_space<vmem>>, vector<192x64xf32>
    %cst_39 = arith.constant dense<0.000000e+00> : vector<2x64xf32>
    %72 = tpu.matmul %70, %71, %cst_39 {dimension_numbers = #tpu.dot_dimension_numbers<[1], [0], [0], [1], [0, 0, 1, 1], [], []>} : vector<2x192xf32>, vector<192x64xf32>, vector<2x64xf32> -> vector<2x64xf32>
    %c0_40 = arith.constant 0 : index
    %c0_41 = arith.constant 0 : index
    %73 = vector.load %arg14[%c0_40, %c0_41] : memref<1x64xf32, #tpu.memory_space<vmem>>, vector<1x64xf32>
    %74 = vector.broadcast %73 : vector<1x64xf32> to vector<2x64xf32>
    %75 = arith.addf %72, %74 : vector<2x64xf32>
    %76 = arith.mulf %75, %75 : vector<2x64xf32>
    %cst_42 = arith.constant dense<0.000000e+00> : vector<2xf32>
    %77 = vector.multi_reduction <add>, %76, %cst_42 [1] : vector<2x64xf32> to vector<2xf32>
    %78 = vector.shape_cast %77 : vector<2xf32> to vector<2x1xf32>
    %cst_43 = arith.constant 1.000000e-24 : f32
    %79 = vector.broadcast %cst_43 : f32 to vector<2x1xf32>
    %80 = arith.maximumf %78, %79 : vector<2x1xf32>
    %81 = math.rsqrt %80 : vector<2x1xf32>
    %82 = vector.broadcast %81 : vector<2x1xf32> to vector<2x64xf32>
    %83 = arith.mulf %75, %82 : vector<2x64xf32>
    %cst_44 = arith.constant dense<0.000000e+00> : vector<2x4xf32>
    %84 = tpu.matmul %83, %69, %cst_44 {dimension_numbers = #tpu.dot_dimension_numbers<[1], [1], [0], [0], [0, 0, 1, 0], [], []>} : vector<2x64xf32>, vector<4x64xf32>, vector<2x4xf32> -> vector<2x4xf32>
    %cst_45 = arith.constant 1.000000e+00 : f32
    %85 = vector.broadcast %cst_45 : f32 to vector<2x4xf32>
    %86 = arith.divf %84, %85 : vector<2x4xf32>
    %cst_46 = arith.constant dense<0xFF800000> : vector<2xf32>
    %87 = vector.multi_reduction <maximumf>, %86, %cst_46 [1] : vector<2x4xf32> to vector<2xf32>
    %88 = vector.shape_cast %87 : vector<2xf32> to vector<2x1xf32>
    %89 = vector.broadcast %88 : vector<2x1xf32> to vector<2x4xf32>
    %90 = arith.subf %86, %89 : vector<2x4xf32>
    %91 = math.exp %90 : vector<2x4xf32>
    %cst_47 = arith.constant dense<0.000000e+00> : vector<2xf32>
    %92 = vector.multi_reduction <add>, %91, %cst_47 [1] : vector<2x4xf32> to vector<2xf32>
    %93 = vector.shape_cast %92 : vector<2xf32> to vector<2x1xf32>
    %94 = tpu.reciprocal %93 {approx = true} : vector<2x1xf32> -> vector<2x1xf32>
    %95 = vector.broadcast %94 : vector<2x1xf32> to vector<2x4xf32>
    %96 = arith.mulf %91, %95 : vector<2x4xf32>
    %97 = tpu.iota {dimensions = array<i32: 0>} : vector<4x4xi32>
    %98 = tpu.iota {dimensions = array<i32: 1>} : vector<4x4xi32>
    %99 = arith.cmpi sle, %97, %98 : vector<4x4xi32>
    %100 = arith.extui %99 : vector<4x4xi1> to vector<4x4xi32>
    %101 = arith.sitofp %100 : vector<4x4xi32> to vector<4x4xf32>
    %cst_48 = arith.constant dense<0.000000e+00> : vector<2x4xf32>
    %102 = tpu.matmul %96, %101, %cst_48 {dimension_numbers = #tpu.dot_dimension_numbers<[1], [0], [0], [1], [0, 0, 1, 1], [], []>} : vector<2x4xf32>, vector<4x4xf32>, vector<2x4xf32> -> vector<2x4xf32>
    %103 = tpu.iota {dimensions = array<i32: 1>} : vector<2x4xi32>
    %c0_49 = arith.constant 0 : index
    %c0_50 = arith.constant 0 : index
    %104 = vector.load %arg4[%c0_49, %c0_50] : memref<2x1xi32, #tpu.memory_space<vmem>>, vector<2x1xi32>
    %c0_51 = arith.constant 0 : index
    %c0_52 = arith.constant 0 : index
    %105 = vector.load %arg3[%c0_51, %c0_52] : memref<2x6xf32, #tpu.memory_space<vmem>>, vector<2x6xf32>
    %cst_53 = arith.constant 0.000000e+00 : f32
    %106 = vector.broadcast %cst_53 : f32 to vector<2x4xf32>
    %c1_i32 = arith.constant 1 : i32
    %107 = vector.broadcast %c1_i32 : i32 to vector<2x1xi32>
    %108 = arith.cmpi sge, %104, %107 : vector<2x1xi32>
    %109 = vector.extract_strided_slice %105 {offsets = [0, 0], sizes = [2, 1], strides = [1, 1]} : vector<2x6xf32> to vector<2x1xf32>
    %110 = vector.broadcast %109 : vector<2x1xf32> to vector<2x4xf32>
    %111 = arith.cmpf ole, %102, %110 : vector<2x4xf32>
    %112 = arith.extui %111 : vector<2x4xi1> to vector<2x4xi32>
    %cst_54 = arith.constant dense<0> : vector<2xi32>
    %113 = vector.multi_reduction <add>, %112, %cst_54 [1] : vector<2x4xi32> to vector<2xi32>
    %114 = vector.shape_cast %113 : vector<2xi32> to vector<2x1xi32>
    %c3_i32 = arith.constant 3 : i32
    %115 = vector.broadcast %c3_i32 : i32 to vector<2x1xi32>
    %116 = arith.minsi %114, %115 : vector<2x1xi32>
    %117 = vector.broadcast %116 : vector<2x1xi32> to vector<2x4xi32>
    %118 = arith.cmpi eq, %103, %117 : vector<2x4xi32>
    %119 = arith.extui %118 : vector<2x4xi1> to vector<2x4xi32>
    %120 = arith.sitofp %119 : vector<2x4xi32> to vector<2x4xf32>
    %121 = arith.extui %108 : vector<2x1xi1> to vector<2x1xi32>
    %122 = arith.sitofp %121 : vector<2x1xi32> to vector<2x1xf32>
    %123 = vector.broadcast %122 : vector<2x1xf32> to vector<2x4xf32>
    %124 = arith.mulf %120, %123 : vector<2x4xf32>
    %125 = arith.addf %106, %124 : vector<2x4xf32>
    %c-1_i32 = arith.constant -1 : i32
    %126 = vector.broadcast %c-1_i32 : i32 to vector<2x1xi32>
    %127 = arith.select %108, %116, %126 : vector<2x1xi1>, vector<2x1xi32>
    %128 = arith.sitofp %127 : vector<2x1xi32> to vector<2x1xf32>
    %c2_i32 = arith.constant 2 : i32
    %129 = vector.broadcast %c2_i32 : i32 to vector<2x1xi32>
    %130 = arith.cmpi sge, %104, %129 : vector<2x1xi32>
    %131 = vector.extract_strided_slice %105 {offsets = [0, 1], sizes = [2, 1], strides = [1, 1]} : vector<2x6xf32> to vector<2x1xf32>
    %132 = vector.broadcast %131 : vector<2x1xf32> to vector<2x4xf32>
    %133 = arith.cmpf ole, %102, %132 : vector<2x4xf32>
    %134 = arith.extui %133 : vector<2x4xi1> to vector<2x4xi32>
    %cst_55 = arith.constant dense<0> : vector<2xi32>
    %135 = vector.multi_reduction <add>, %134, %cst_55 [1] : vector<2x4xi32> to vector<2xi32>
    %136 = vector.shape_cast %135 : vector<2xi32> to vector<2x1xi32>
    %c3_i32_56 = arith.constant 3 : i32
    %137 = vector.broadcast %c3_i32_56 : i32 to vector<2x1xi32>
    %138 = arith.minsi %136, %137 : vector<2x1xi32>
    %139 = vector.broadcast %138 : vector<2x1xi32> to vector<2x4xi32>
    %140 = arith.cmpi eq, %103, %139 : vector<2x4xi32>
    %141 = arith.extui %140 : vector<2x4xi1> to vector<2x4xi32>
    %142 = arith.sitofp %141 : vector<2x4xi32> to vector<2x4xf32>
    %143 = arith.extui %130 : vector<2x1xi1> to vector<2x1xi32>
    %144 = arith.sitofp %143 : vector<2x1xi32> to vector<2x1xf32>
    %145 = vector.broadcast %144 : vector<2x1xf32> to vector<2x4xf32>
    %146 = arith.mulf %142, %145 : vector<2x4xf32>
    %147 = arith.addf %125, %146 : vector<2x4xf32>
    %c-1_i32_57 = arith.constant -1 : i32
    %148 = vector.broadcast %c-1_i32_57 : i32 to vector<2x1xi32>
    %149 = arith.select %130, %138, %148 : vector<2x1xi1>, vector<2x1xi32>
    %150 = arith.sitofp %149 : vector<2x1xi32> to vector<2x1xf32>
    %c3_i32_58 = arith.constant 3 : i32
    %151 = vector.broadcast %c3_i32_58 : i32 to vector<2x1xi32>
    %152 = arith.cmpi sge, %104, %151 : vector<2x1xi32>
    %153 = vector.extract_strided_slice %105 {offsets = [0, 2], sizes = [2, 1], strides = [1, 1]} : vector<2x6xf32> to vector<2x1xf32>
    %154 = vector.broadcast %153 : vector<2x1xf32> to vector<2x4xf32>
    %155 = arith.cmpf ole, %102, %154 : vector<2x4xf32>
    %156 = arith.extui %155 : vector<2x4xi1> to vector<2x4xi32>
    %cst_59 = arith.constant dense<0> : vector<2xi32>
    %157 = vector.multi_reduction <add>, %156, %cst_59 [1] : vector<2x4xi32> to vector<2xi32>
    %158 = vector.shape_cast %157 : vector<2xi32> to vector<2x1xi32>
    %c3_i32_60 = arith.constant 3 : i32
    %159 = vector.broadcast %c3_i32_60 : i32 to vector<2x1xi32>
    %160 = arith.minsi %158, %159 : vector<2x1xi32>
    %161 = vector.broadcast %160 : vector<2x1xi32> to vector<2x4xi32>
    %162 = arith.cmpi eq, %103, %161 : vector<2x4xi32>
    %163 = arith.extui %162 : vector<2x4xi1> to vector<2x4xi32>
    %164 = arith.sitofp %163 : vector<2x4xi32> to vector<2x4xf32>
    %165 = arith.extui %152 : vector<2x1xi1> to vector<2x1xi32>
    %166 = arith.sitofp %165 : vector<2x1xi32> to vector<2x1xf32>
    %167 = vector.broadcast %166 : vector<2x1xf32> to vector<2x4xf32>
    %168 = arith.mulf %164, %167 : vector<2x4xf32>
    %169 = arith.addf %147, %168 : vector<2x4xf32>
    %c-1_i32_61 = arith.constant -1 : i32
    %170 = vector.broadcast %c-1_i32_61 : i32 to vector<2x1xi32>
    %171 = arith.select %152, %160, %170 : vector<2x1xi1>, vector<2x1xi32>
    %172 = arith.sitofp %171 : vector<2x1xi32> to vector<2x1xf32>
    %c4_i32 = arith.constant 4 : i32
    %173 = vector.broadcast %c4_i32 : i32 to vector<2x1xi32>
    %174 = arith.cmpi sge, %104, %173 : vector<2x1xi32>
    %175 = vector.extract_strided_slice %105 {offsets = [0, 3], sizes = [2, 1], strides = [1, 1]} : vector<2x6xf32> to vector<2x1xf32>
    %176 = vector.broadcast %175 : vector<2x1xf32> to vector<2x4xf32>
    %177 = arith.cmpf ole, %102, %176 : vector<2x4xf32>
    %178 = arith.extui %177 : vector<2x4xi1> to vector<2x4xi32>
    %cst_62 = arith.constant dense<0> : vector<2xi32>
    %179 = vector.multi_reduction <add>, %178, %cst_62 [1] : vector<2x4xi32> to vector<2xi32>
    %180 = vector.shape_cast %179 : vector<2xi32> to vector<2x1xi32>
    %c3_i32_63 = arith.constant 3 : i32
    %181 = vector.broadcast %c3_i32_63 : i32 to vector<2x1xi32>
    %182 = arith.minsi %180, %181 : vector<2x1xi32>
    %183 = vector.broadcast %182 : vector<2x1xi32> to vector<2x4xi32>
    %184 = arith.cmpi eq, %103, %183 : vector<2x4xi32>
    %185 = arith.extui %184 : vector<2x4xi1> to vector<2x4xi32>
    %186 = arith.sitofp %185 : vector<2x4xi32> to vector<2x4xf32>
    %187 = arith.extui %174 : vector<2x1xi1> to vector<2x1xi32>
    %188 = arith.sitofp %187 : vector<2x1xi32> to vector<2x1xf32>
    %189 = vector.broadcast %188 : vector<2x1xf32> to vector<2x4xf32>
    %190 = arith.mulf %186, %189 : vector<2x4xf32>
    %191 = arith.addf %169, %190 : vector<2x4xf32>
    %c-1_i32_64 = arith.constant -1 : i32
    %192 = vector.broadcast %c-1_i32_64 : i32 to vector<2x1xi32>
    %193 = arith.select %174, %182, %192 : vector<2x1xi1>, vector<2x1xi32>
    %194 = arith.sitofp %193 : vector<2x1xi32> to vector<2x1xf32>
    %c5_i32 = arith.constant 5 : i32
    %195 = vector.broadcast %c5_i32 : i32 to vector<2x1xi32>
    %196 = arith.cmpi sge, %104, %195 : vector<2x1xi32>
    %197 = vector.extract_strided_slice %105 {offsets = [0, 4], sizes = [2, 1], strides = [1, 1]} : vector<2x6xf32> to vector<2x1xf32>
    %198 = vector.broadcast %197 : vector<2x1xf32> to vector<2x4xf32>
    %199 = arith.cmpf ole, %102, %198 : vector<2x4xf32>
    %200 = arith.extui %199 : vector<2x4xi1> to vector<2x4xi32>
    %cst_65 = arith.constant dense<0> : vector<2xi32>
    %201 = vector.multi_reduction <add>, %200, %cst_65 [1] : vector<2x4xi32> to vector<2xi32>
    %202 = vector.shape_cast %201 : vector<2xi32> to vector<2x1xi32>
    %c3_i32_66 = arith.constant 3 : i32
    %203 = vector.broadcast %c3_i32_66 : i32 to vector<2x1xi32>
    %204 = arith.minsi %202, %203 : vector<2x1xi32>
    %205 = vector.broadcast %204 : vector<2x1xi32> to vector<2x4xi32>
    %206 = arith.cmpi eq, %103, %205 : vector<2x4xi32>
    %207 = arith.extui %206 : vector<2x4xi1> to vector<2x4xi32>
    %208 = arith.sitofp %207 : vector<2x4xi32> to vector<2x4xf32>
    %209 = arith.extui %196 : vector<2x1xi1> to vector<2x1xi32>
    %210 = arith.sitofp %209 : vector<2x1xi32> to vector<2x1xf32>
    %211 = vector.broadcast %210 : vector<2x1xf32> to vector<2x4xf32>
    %212 = arith.mulf %208, %211 : vector<2x4xf32>
    %213 = arith.addf %191, %212 : vector<2x4xf32>
    %c-1_i32_67 = arith.constant -1 : i32
    %214 = vector.broadcast %c-1_i32_67 : i32 to vector<2x1xi32>
    %215 = arith.select %196, %204, %214 : vector<2x1xi1>, vector<2x1xi32>
    %216 = arith.sitofp %215 : vector<2x1xi32> to vector<2x1xf32>
    %c6_i32 = arith.constant 6 : i32
    %217 = vector.broadcast %c6_i32 : i32 to vector<2x1xi32>
    %218 = arith.cmpi sge, %104, %217 : vector<2x1xi32>
    %219 = vector.extract_strided_slice %105 {offsets = [0, 5], sizes = [2, 1], strides = [1, 1]} : vector<2x6xf32> to vector<2x1xf32>
    %220 = vector.broadcast %219 : vector<2x1xf32> to vector<2x4xf32>
    %221 = arith.cmpf ole, %102, %220 : vector<2x4xf32>
    %222 = arith.extui %221 : vector<2x4xi1> to vector<2x4xi32>
    %cst_68 = arith.constant dense<0> : vector<2xi32>
    %223 = vector.multi_reduction <add>, %222, %cst_68 [1] : vector<2x4xi32> to vector<2xi32>
    %224 = vector.shape_cast %223 : vector<2xi32> to vector<2x1xi32>
    %c3_i32_69 = arith.constant 3 : i32
    %225 = vector.broadcast %c3_i32_69 : i32 to vector<2x1xi32>
    %226 = arith.minsi %224, %225 : vector<2x1xi32>
    %227 = vector.broadcast %226 : vector<2x1xi32> to vector<2x4xi32>
    %228 = arith.cmpi eq, %103, %227 : vector<2x4xi32>
    %229 = arith.extui %228 : vector<2x4xi1> to vector<2x4xi32>
    %230 = arith.sitofp %229 : vector<2x4xi32> to vector<2x4xf32>
    %231 = arith.extui %218 : vector<2x1xi1> to vector<2x1xi32>
    %232 = arith.sitofp %231 : vector<2x1xi32> to vector<2x1xf32>
    %233 = vector.broadcast %232 : vector<2x1xf32> to vector<2x4xf32>
    %234 = arith.mulf %230, %233 : vector<2x4xf32>
    %235 = arith.addf %213, %234 : vector<2x4xf32>
    %c-1_i32_70 = arith.constant -1 : i32
    %236 = vector.broadcast %c-1_i32_70 : i32 to vector<2x1xi32>
    %237 = arith.select %218, %226, %236 : vector<2x1xi1>, vector<2x1xi32>
    %238 = arith.sitofp %237 : vector<2x1xi32> to vector<2x1xf32>
    %cst_71 = arith.constant 0.000000e+00 : f32
    %239 = vector.broadcast %cst_71 : f32 to vector<2x4xf32>
    %240 = arith.cmpf ogt, %235, %239 : vector<2x4xf32>
    %241 = math.log %96 : vector<2x4xf32>
    %cst_72 = arith.constant 0.000000e+00 : f32
    %242 = vector.broadcast %cst_72 : f32 to vector<2x4xf32>
    %243 = arith.select %240, %241, %242 : vector<2x4xi1>, vector<2x4xf32>
    %244 = arith.mulf %235, %243 : vector<2x4xf32>
    %cst_73 = arith.constant dense<0.000000e+00> : vector<2xf32>
    %245 = vector.multi_reduction <add>, %244, %cst_73 [1] : vector<2x4xf32> to vector<2xf32>
    %246 = vector.shape_cast %245 : vector<2xf32> to vector<2x1xf32>
    %247 = vector.shape_cast %61 : vector<1x1xf32> to vector<1x1xf32>
    %248 = vector.broadcast %247 : vector<1x1xf32> to vector<2x1xf32>
    %cst_74 = arith.constant 0.000000e+00 : f32
    %249 = vector.broadcast %cst_74 : f32 to vector<2x112xf32>
    %250 = tpu.concatenate %96, %235, %128, %150, %172, %194, %216, %238, %246, %248, %249 in 1 : vector<2x4xf32>, vector<2x4xf32>, vector<2x1xf32>, vector<2x1xf32>, vector<2x1xf32>, vector<2x1xf32>, vector<2x1xf32>, vector<2x1xf32>, vector<2x1xf32>, vector<2x1xf32>, vector<2x112xf32> -> vector<2x128xf32>
    %c0_75 = arith.constant 0 : index
    %c0_76 = arith.constant 0 : index
    %251 = vector.load %arg15[%c0_75, %c0_76] : memref<2x128xf32, #tpu.memory_space<vmem>>, vector<2x128xf32>
    tpu.vector_store %arg15[%c0_75, %c0_76], %250 {strides = array<i32>} : memref<2x128xf32, #tpu.memory_space<vmem>>, vector<2x128xf32>,
    return
  }
}

</mosaic_0001>

<bundles_post_ra>
// kernel: llm_router_forward.3
= control target key start
LH: loop header
LB: loop body
LE: loop exit
PB: predicated region body
PF: predicated region fallthrough
CT: control target
= control target key end

     0   :  { %v1671_v3 = vmov 0.0|0.0   ;;  %vm1672_vm0 = vmmov 0   ;;  %v1673_v4 = vmov 0.0   ;;  %vm266_vm1 = vcmask 523264   ;;  %s1684_s22 = smov 4   ;;  %s1685_s23 = smov 11   ;;  %s2338_s5 = inlined_call_operand.vmem [shape: f32[384,64], index: 5, kind: input, shape index: {}]   ;;  %s2339_s0 = inlined_call_operand.vmem [shape: f32[4,384], index: 0, kind: input, shape index: {}]   ;;  %s2340_s7 = inlined_call_operand.vmem [shape: f32[64,128], index: 7, kind: input, shape index: {}]   ;;  %s2341_s6 = inlined_call_operand.vmem [shape: f32[1,64], index: 6, kind: input, shape index: {}]   ;;  %s2342_s9 = inlined_call_operand.vmem [shape: f32[64,64], index: 9, kind: input, shape index: {}]   ;;  %s2343_s8 = inlined_call_operand.vmem [shape: f32[1,128], index: 8, kind: input, shape index: {}]   ;;  %s2344_s1 = inlined_call_operand.vmem [shape: f32[4,64], index: 1, kind: input, shape index: {}]   ;;  %s2345_s11 = inlined_call_operand.vmem [shape: f32[64,384], index: 11, kind: input, shape index: {}]   ;;  %s2346_s10 = inlined_call_operand.vmem [shape: f32[1,64], index: 10, kind: input, shape index: {}]   ;;  %s2347_s13 = inlined_call_operand.vmem [shape: f32[192,64], index: 13, kind: input, shape index: {}]   ;;  %s2348_s2 = inlined_call_operand.vmem [shape: f32[2,192], index: 2, kind: input, shape index: {}]   ;;  %s2349_s12 = inlined_call_operand.vmem [shape: f32[1,384], index: 12, kind: input, shape index: {}]   ;;  %s2350_s14 = inlined_call_operand.vmem [shape: f32[1,64], index: 14, kind: input, shape index: {}]   ;;  %s2351_s3 = inlined_call_operand.vmem [shape: f32[2,6], index: 3, kind: input, shape index: {}]   ;;  %s2352_s4 = inlined_call_operand.vmem [shape: s32[2,1], index: 4, kind: input, shape index: {}]   ;;  %s2353_s15 = inlined_call_operand.vmem [shape: f32[2,128], index: 15, kind: output, shape index: {}]  }
   0x1   :  { %v68_v0 = vld [vmem:[%s2338_s5 + $0x80] sm:$0xff]  ;;  %v69_v1 = vld [vmem:[%s2338_s5 + $0x88] sm:$0xff]  ;;  %1509 = vmatprep.subr.bf16.mxu1 %v1671_v3  ;;  %1407 = vmatprep.mubr.msk.f32.mxu1 %vm1672_vm0, %v1673_v4  ;;  %v70_v7 = vld [vmem:[%s2338_s5 + $0x90] sm:$0xff]  ;;  %vm669_vm2 = vcmask 519168   ;;  %vm631_vm3 = vcmask 1043456   ;;  %vm807_vm4 = vcmask 517120  }
   0x2   :  { %v52_v2 = vld [vmem:[%s2338_s5] sm:$0xff]  ;;  %v1477_v5 = vpack.c.bf16 %v69_v1, %v68_v0  ;;  %v53_v6 = vld [vmem:[%s2338_s5 + $0x8] sm:$0xff]  ;;  %v71_v8 = vld [vmem:[%s2338_s5 + $0x98] sm:$0xff]  ;;  %vm890_vm5 = vcmask 25600   ;;  %vm909_vm7 = vcmask 31744   ;;  %s1686_s24 = smov 13  }
   0x3   :  { %v1479_v9 = vpack.c.bf16 %v53_v6, %v52_v2  ;;  %v1481_v10 = vpack.c.bf16 %v71_v8, %v70_v7  ;;  %v54_v11 = vld [vmem:[%s2338_s5 + $0x10] sm:$0xff]  ;;  %v55_v12 = vld [vmem:[%s2338_s5 + $0x18] sm:$0xff]  ;;  %v84_v13 = vld [vmem:[%s2338_s5 + $0x100] sm:$0xff] }
   0x4   :  { %1478 = vmatprep.subr.bf16.mxu0 %v1477_v5  ;;  %v85_v14 = vld [vmem:[%s2338_s5 + $0x108] sm:$0xff]  ;;  %v72_v15 = vld [vmem:[%s2338_s5 + $0xa0] sm:$0xff]  ;;  %v1483_v17 = vpack.c.bf16 %v55_v12, %v54_v11  ;;  %v86_v19 = vld [vmem:[%s2338_s5 + $0x110] sm:$0xff] }
   0x5   :  { %v73_v16 = vld [vmem:[%s2338_s5 + $0xa8] sm:$0xff]  ;;  %1480 = vmatpush3.bf16.msra.mxu0 %v1479_v9  ;;  %v1510_v18 = vpack.c.bf16 %v85_v14, %v84_v13  ;;  %v56_v21 = vld [vmem:[%s2338_s5 + $0x20] sm:$0xff]  ;;  %v87_v23 = vld [vmem:[%s2338_s5 + $0x118] sm:$0xff] }
   0x6   :  { %1482 = vmatprep.subr.bf16.mxu0 %v1481_v10  ;;  %v1485_v20 = vpack.c.bf16 %v73_v16, %v72_v15  ;;  %v57_v22 = vld [vmem:[%s2338_s5 + $0x28] sm:$0xff]  ;;  %v1513_v24 = vpack.c.bf16 %v87_v23, %v86_v19  ;;  %v74_v25 = vld [vmem:[%s2338_s5 + $0xb0] sm:$0xff]  ;;  %v75_v26 = vld [vmem:[%s2338_s5 + $0xb8] sm:$0xff] }
   0x7   :  { %1511 = vmatpush3.bf16.msra.mxu1 %v1510_v18  ;;  %v88_v27 = vld [vmem:[%s2338_s5 + $0x120] sm:$0xff]  ;;  %v89_v28 = vld [vmem:[%s2338_s5 + $0x128] sm:$0xff]  ;;  %v1487_v29 = vpack.c.bf16 %v57_v22, %v56_v21  ;;  %v1489_v30 = vpack.c.bf16 %v75_v26, %v74_v25  ;;  %v58_v31 = vld [vmem:[%s2338_s5 + $0x30] sm:$0xff] }
   0x8   :  { %1512 = vmatprep.subr.bf16.mxu1 %v1671_v3  ;;  %v59_v32 = vld [vmem:[%s2338_s5 + $0x38] sm:$0xff]  ;;  %v1516_v33 = vpack.c.bf16 %v89_v28, %v88_v27  ;;  %v76_v34 = vld [vmem:[%s2338_s5 + $0xc0] sm:$0xff]  ;;  %v77_v35 = vld [vmem:[%s2338_s5 + $0xc8] sm:$0xff] }
   0x9   :  { %1484 = vmatpush3.bf16.msra.mxu0 %v1483_v17  ;;  %v90_v36 = vld [vmem:[%s2338_s5 + $0x130] sm:$0xff]  ;;  %v91_v37 = vld [vmem:[%s2338_s5 + $0x138] sm:$0xff]  ;;  %v1491_v38 = vpack.c.bf16 %v59_v32, %v58_v31  ;;  %v1493_v39 = vpack.c.bf16 %v77_v35, %v76_v34  ;;  %v60_v40 = vld [vmem:[%s2338_s5 + $0x40] sm:$0xff] }
   0xa   :  { %1486 = vmatprep.subr.bf16.mxu0 %v1485_v20  ;;  %v61_v41 = vld [vmem:[%s2338_s5 + $0x48] sm:$0xff]  ;;  %v1519_v42 = vpack.c.bf16 %v91_v37, %v90_v36  ;;  %v78_v43 = vld [vmem:[%s2338_s5 + $0xd0] sm:$0xff]  ;;  %v79_v44 = vld [vmem:[%s2338_s5 + $0xd8] sm:$0xff] }
   0xb   :  { %1514 = vmatpush3.bf16.msra.mxu1 %v1513_v24  ;;  %v92_v45 = vld [vmem:[%s2338_s5 + $0x140] sm:$0xff]  ;;  %v93_v46 = vld [vmem:[%s2338_s5 + $0x148] sm:$0xff]  ;;  %v1495_v48 = vpack.c.bf16 %v61_v41, %v60_v40  ;;  %v1497_v50 = vpack.c.bf16 %v79_v44, %v78_v43  ;;  %v62_v51 = vld [vmem:[%s2338_s5 + $0x50] sm:$0xff] }
   0xc   :  { %1515 = vmatprep.subr.bf16.mxu1 %v1671_v3  ;;  %v1873_v47 = vld [vmem:[%s2339_s0] sm:$0xff]  ;;  %v63_v52 = vld [vmem:[%s2338_s5 + $0x58] sm:$0xff]  ;;  %v1522_v53 = vpack.c.bf16 %v93_v46, %v92_v45  ;;  %v81_v55 = vld [vmem:[%s2338_s5 + $0xe8] sm:$0xff] }
   0xd   :  { %1488 = vmatpush3.bf16.msra.mxu0 %v1487_v29  ;;  %v1877_v49 = vcombine.high %v1873_v47, %v1873_v47  ;;  %v80_v54 = vld [vmem:[%s2338_s5 + $0xe0] sm:$0xff]  ;;  %v94_v56 = vld [vmem:[%s2338_s5 + $0x150] sm:$0xff]  ;;  %v95_v57 = vld [vmem:[%s2338_s5 + $0x158] sm:$0xff]  ;;  %v1499_v58 = vpack.c.bf16 %v63_v52, %v62_v51 }
   0xe   :  { %1490 = vmatprep.subr.bf16.mxu0 %v1489_v30  ;;  %v1501_v59 = vpack.c.bf16 %v81_v55, %v80_v54  ;;  %v64_v60 = vld [vmem:[%s2338_s5 + $0x60] sm:$0xff]  ;;  %v65_v61 = vld [vmem:[%s2338_s5 + $0x68] sm:$0xff]  ;;  %v1525_v62 = vpack.c.bf16 %v95_v57, %v94_v56  ;;  %v82_v63 = vld [vmem:[%s2338_s5 + $0xf0] sm:$0xff] }
   0xf   :  { %1517 = vmatpush3.bf16.msra.mxu1 %v1516_v33  ;;  %174 = vmatprep.mubr.f32.mxu0 %v1877_v49  ;;  %v83_v0 = vld [vmem:[%s2338_s5 + $0xf8] sm:$0xff]  ;;  %v96_v1 = vld [vmem:[%s2338_s5 + $0x160] sm:$0xff]  ;;  %v97_v2 = vld [vmem:[%s2338_s5 + $0x168] sm:$0xff]  ;;  %v1503_v5 = vpack.c.bf16 %v65_v61, %v64_v60 }
  0x10   :  { %1518 = vmatprep.subr.bf16.mxu1 %v1671_v3  ;;  %v1505_v6 = vpack.c.bf16 %v83_v0, %v82_v63  ;;  %v66_v7 = vld [vmem:[%s2338_s5 + $0x70] sm:$0xff]  ;;  %v67_v8 = vld [vmem:[%s2338_s5 + $0x78] sm:$0xff]  ;;  %v1528_v9 = vpack.c.bf16 %v97_v2, %v96_v1  ;;  %v251_v14 = vld [vmem:[%s2340_s7] sm:$0xff] }
  0x11   :  { %1492 = vmatpush3.bf16.msra.mxu0 %v1491_v38  ;;  %v98_v10 = vld [vmem:[%s2338_s5 + $0x170] sm:$0xff]  ;;  %v99_v11 = vld [vmem:[%s2338_s5 + $0x178] sm:$0xff]  ;;  %v1507_v12 = vpack.c.bf16 %v67_v8, %v66_v7  ;;  %v252_v15 = vld [vmem:[%s2340_s7 + $0x8] sm:$0xff] }
  0x12   :  { %1494 = vmatprep.subr.bf16.mxu0 %v1493_v39  ;;  %v1531_v13 = vpack.c.bf16 %v99_v11, %v98_v10  ;;  %v1941_v16 = vld [vmem:[%s2339_s0 + $0x8] sm:$0xf]  ;;  %v1534_v17 = vpack.c.bf16 %v252_v15, %v251_v14  ;;  %v253_v18 = vld [vmem:[%s2340_s7 + $0x10] sm:$0xff]  ;;  %v254_v19 = vld [vmem:[%s2340_s7 + $0x18] sm:$0xff] }
  0x13   :  { %1520 = vmatpush3.bf16.msra.mxu1 %v1519_v42  ;;  %v1537_v20 = vpack.c.bf16 %v254_v19, %v253_v18  ;;  %v255_v21 = vld [vmem:[%s2340_s7 + $0x20] sm:$0xff]  ;;  %v256_v22 = vld [vmem:[%s2340_s7 + $0x28] sm:$0xff]  ;;  %v257_v24 = vld [vmem:[%s2340_s7 + $0x30] sm:$0xff] }
  0x14   :  { %1521 = vmatprep.subr.bf16.mxu1 %v1671_v3  ;;  %v1540_v23 = vpack.c.bf16 %v256_v22, %v255_v21  ;;  %v258_v25 = vld [vmem:[%s2340_s7 + $0x38] sm:$0xff]  ;;  %v1265_v29 = vld [vmem:[%s2341_s6] ss:$0 sm:$0xff]  ;;  %v352_v37 = vld [vmem:[%s2342_s9 + $0x8] sm:$0xff] }
  0x15   :  { %1496 = vmatpush3.bf16.msra.mxu0 %v1495_v48  ;;  %v1543_v26 = vpack.c.bf16 %v258_v25, %v257_v24  ;;  %v351_v36 = vld [vmem:[%s2342_s9] sm:$0xff]  ;;  %v353_v38 = vld [vmem:[%s2342_s9 + $0x10] sm:$0xff]  ;;  %v354_v40 = vld [vmem:[%s2342_s9 + $0x18] sm:$0xff] }
  0x16   :  { %1498 = vmatprep.subr.bf16.mxu0 %v1497_v50  ;;  %v1546_v39 = vpack.c.bf16 %v352_v37, %v351_v36  ;;  %v1549_v41 = vpack.c.bf16 %v354_v40, %v353_v38  ;;  %v355_v42 = vld [vmem:[%s2342_s9 + $0x20] sm:$0xff]  ;;  %v356_v43 = vld [vmem:[%s2342_s9 + $0x28] sm:$0xff]  ;;  %v358_v54 = vld [vmem:[%s2342_s9 + $0x38] sm:$0xff] }
  0x17   :  { %1523 = vmatpush3.bf16.msra.mxu1 %v1522_v53  ;;  %v1552_v44 = vpack.c.bf16 %v356_v43, %v355_v42  ;;  %v1266_v45 = vld [vmem:[%s2343_s8] ss:$0 sm:$0xff]  ;;  %v357_v53 = vld [vmem:[%s2342_s9 + $0x30] sm:$0xff]  ;;  %s1674_s8 = smov 64   ;;  %v445_v1 = vld [vmem:[%s2345_s11 + $0x28] sm:$0xff] }
  0x18   :  { %1524 = vmatprep.subr.bf16.mxu1 %v1671_v3  ;;  %v1555_v55 = vpack.c.bf16 %v358_v54, %v357_v53  ;;  %v442_v0 = vld [vmem:[%s2345_s11 + $0x10] sm:$0xff]  ;;  %v441_v2 = vld [vmem:[%s2345_s11 + $0x8] sm:$0xff]  ;;  %v448_v7 = vld [vmem:[%s2345_s11 + $0x40] sm:$0xff] }
  0x19   :  { %1500 = vmatpush3.bf16.msra.mxu0 %v1499_v58  ;;  %v344_v58 = vld [vmem:[%s2344_s1] sm:$0xf]  ;;  %v451_v8 = vld [vmem:[%s2345_s11 + $0x58] sm:$0xff]  ;;  %v450_v15 = vld [vmem:[%s2345_s11 + $0x50] sm:$0xff] }
  0x1a   :  { %1502 = vmatprep.subr.bf16.mxu0 %v1501_v59  ;;  %v440_v10 = vld [vmem:[%s2345_s11] sm:$0xff]  ;;  %v443_v11 = vld [vmem:[%s2345_s11 + $0x18] sm:$0xff]  ;;  %v457_v18 = vld [vmem:[%s2345_s11 + $0x88] sm:$0xff] }
  0x1b   :  { %1526 = vmatpush3.bf16.msra.mxu1 %v1525_v62  ;;  %v1559_v14 = vpack.c.bf16 %v443_v11, %v440_v10  ;;  %v449_v21 = vld [vmem:[%s2345_s11 + $0x48] sm:$0xff]  ;;  %v456_v24 = vld [vmem:[%s2345_s11 + $0x80] sm:$0xff]  ;;  %v458_v36 = vld [vmem:[%s2345_s11 + $0x90] sm:$0xff] }
  0x1c   :  { %1527 = vmatprep.subr.bf16.mxu1 %v1671_v3  ;;  %v453_v22 = vld [vmem:[%s2345_s11 + $0x68] sm:$0xff]  ;;  %v693_v42 = vld [vmem:[%s2347_s13] sm:$0xff]  ;;  %v695_v54 = vld [vmem:[%s2347_s13 + $0x10] sm:$0xff] }
  0x1d   :  { %1504 = vmatpush3.bf16.msra.mxu0 %v1503_v5  ;;  %v1574_v5 = vpack.c.bf16 %v445_v1, %v442_v0  ;;  %v1565_v25 = vpack.c.bf16 %v456_v24, %v453_v22  ;;  %v461_v37 = vld [vmem:[%s2345_s11 + $0xa8] sm:$0xff]  ;;  %v701_v1 = vld [vmem:[%s2347_s13 + $0x40] sm:$0xff] }
  0x1e   :  { %1506 = vmatprep.subr.bf16.mxu0 %v1505_v6  ;;  %v444_v6 = vld [vmem:[%s2345_s11 + $0x20] sm:$0xff]  ;;  %v1571_v38 = vpack.c.bf16 %v461_v37, %v458_v36  ;;  %v694_v43 = vld [vmem:[%s2347_s13 + $0x8] sm:$0xff] }
  0x1f   :  { %1529 = vmatpush3.bf16.msra.mxu1 %v1528_v9  ;;  %v1557_v9 = vpack.c.bf16 %v444_v6, %v441_v2  ;;  %v702_v2 = vld [vmem:[%s2347_s13 + $0x48] sm:$0xff]  ;;  %v703_v6 = vld [vmem:[%s2347_s13 + $0x50] sm:$0xff]  ;;  %v713_v22 = vld [vmem:[%s2347_s13 + $0xa0] sm:$0xff] }
  0x20   :  { %1530 = vmatprep.subr.bf16.mxu1 %v1671_v3  ;;  %v706_v10 = vld [vmem:[%s2347_s13 + $0x68] sm:$0xff] }
  0x21   :  { %1508 = vmatpush3.bf16.msra.mxu0 %v1507_v12  ;;  %v447_v12 = vld [vmem:[%s2345_s11 + $0x38] sm:$0xff] }
  0x22   :  { %1558 = vmatprep.subr.bf16.mxu0 %v1557_v9  ;;  %v1561_v19 = vpack.c.bf16 %v450_v15, %v447_v12  ;;  %v705_v9 = vld [vmem:[%s2347_s13 + $0x60] sm:$0xff]  ;;  %v707_v12 = vld [vmem:[%s2347_s13 + $0x70] sm:$0xff] }
  0x23   :  { %1532 = vmatpush3.bf16.msra.mxu1 %v1531_v13  ;;  %v1577_v13 = vpack.c.bf16 %v451_v8, %v448_v7  ;;  %v704_v7 = vld [vmem:[%s2347_s13 + $0x58] sm:$0xff]  ;;  %v1604_v11 = vpack.c.bf16 %v706_v10, %v705_v9  ;;  %v709_v15 = vld [vmem:[%s2347_s13 + $0x80] sm:$0xff] }
  0x24   :  { %175 = vmatmul.mubr.f32.vlgmr.msra.gmra.mrb[0].mxu0 %v1873_v47  ;;  %1533 = vmatprep.subr.bf16.mxu1 %v1671_v3  ;;  %v1601_v8 = vpack.c.bf16 %v704_v7, %v703_v6 }
  0x25   :  { %548 = vmatprep.mubr.f32.mxu0 %v1673_v4  ;;  %1560 = vmatpush1.bf16.msra.mxu0 %v1559_v14 }
  0x26   :  { %1408 = vmatmul.mubr.f32.vlgmr.msra.gmra.mrb[0].mxu1 %v1941_v16  ;;  %1562 = vmatprep.subr.bf16.mxu0 %v1561_v19  ;;  %v711_v19 = vld [vmem:[%s2347_s13 + $0x90] sm:$0xff] }
  0x27   :  { %1535 = vmatpush3.bf16.msra.mxu1 %v1534_v17  ;;  %1426 = vmatprep.mubr.msk.f32.mxu1 %vm1672_vm0, %v1673_v4  ;;  %v454_v17 = vld [vmem:[%s2345_s11 + $0x70] sm:$0xff] }
  0x28   :  { %1536 = vmatprep.subr.bf16.mxu1 %v1671_v3 }
  0x2b   :  { %1538 = vmatpush3.bf16.msra.mxu1 %v1537_v20  ;;  %v446_v20 = vld [vmem:[%s2345_s11 + $0x30] sm:$0xff] }
  0x2c   :  { %1539 = vmatprep.subr.bf16.mxu1 %v1671_v3 }
  0x2f   :  { %1541 = vmatpush3.bf16.msra.mxu1 %v1540_v23  ;;  %v1563_v23 = vpack.c.bf16 %v449_v21, %v446_v20  ;;  %v712_v20 = vld [vmem:[%s2347_s13 + $0x98] sm:$0xff] }
  0x30   :  { %1542 = vmatprep.subr.bf16.mxu1 %v1671_v3  ;;  %v1613_v21 = vpack.c.bf16 %v712_v20, %v711_v19 }
  0x31   :  { %1564 = vmatpush1.bf16.msra.mxu0 %v1563_v23  ;;  %v714_v23 = vld [vmem:[%s2347_s13 + $0xa8] sm:$0xff] }
  0x32   :  { %1566 = vmatprep.subr.bf16.mxu0 %v1565_v25  ;;  %v1616_v24 = vpack.c.bf16 %v714_v23, %v713_v22  ;;  %v715_v25 = vld [vmem:[%s2347_s13 + $0xb0] sm:$0xff] }
  0x33   :  { %1544 = vmatpush3.bf16.msra.mxu1 %v1543_v26  ;;  %v452_v26 = vld [vmem:[%s2345_s11 + $0x60] sm:$0xff] }
  0x34   :  { %1545 = vmatprep.subr.bf16.mxu1 %v1671_v3 }
  0xf7   :  { %v1324_v27 = vpop.f32.mrb[0].mxu0 }
  0xf8   :  { %v1325_v28 = vpop.f32.mrb[1].mxu0 }
  0xf9   :  { %v1326_v30 = vadd.f32 %v1325_v28, %v1324_v27  ;;  %v246_v31 = vpop.f32.mrb[0].mxu1  ;;  %v455_v27 = vld [vmem:[%s2345_s11 + $0x78] sm:$0xff]  ;;  %v1580_v28 = vpack.c.bf16 %v457_v18, %v454_v17  ;;  %v710_v17 = vld [vmem:[%s2347_s13 + $0x88] sm:$0xff] }
  0xfa   :  { %v1409_v32 = vpop.f32.mrb[1].mxu1  ;;  %v1610_v18 = vpack.c.bf16 %v710_v17, %v709_v15  ;;  %v1675_v15 = vmov 0  }
  0xfb   :  { %v177_v33 = vadd.f32 %v1326_v30, %v1265_v29  ;;  %v460_v29 = vld [vmem:[%s2345_s11 + $0xa0] sm:$0xff]  ;;  %v463_v30 = vld [vmem:[%s2345_s11 + $0xb8] sm:$0xff]  ;;  %1642 = vset.pattern.permute.xlu0 %v1675_v15  ;;  %1643 = vset.pattern.permute.xlu1 %v1675_v15 }
  0xfc   :  { %v1583_v32 = vpack.c.bf16 %v463_v30, %v460_v29 }
  0xfd   :  { %v247_v34 = vadd.f32 %v246_v31, %v177_v33  ;;  %v1567_v31 = vpack.c.bf16 %v455_v27, %v452_v26  ;;  %v459_v33 = vld [vmem:[%s2345_s11 + $0x98] sm:$0xff] }
  0xfe   :  { %v716_v26 = vld [vmem:[%s2347_s13 + $0xb8] sm:$0xff] }
  0xff   :  { %v250_v35 = vmax.f32 %v247_v34, 0.0  ;;  %1568 = vmatpush1.bf16.msra.mxu0 %v1567_v31  ;;  %v462_v34 = vld [vmem:[%s2345_s11 + $0xb0] sm:$0xff]  ;;  %v1619_v27 = vpack.c.bf16 %v716_v26, %v715_v25 }
 0x101   :  { %1427 = vmatmul.mubr.msk.f32.vlgmr.msra.gmra.mrb[2].mxu1 %vm266_vm1, %v250_v35  ;;  %v1569_v35 = vpack.c.bf16 %v462_v34, %v459_v33 }
 0x102   :  { %1445 = vmatprep.mubr.msk.f32.mxu1 %vm1672_vm0, %v1673_v4  ;;  %1547 = vmatpush3.bf16.msra.mxu1 %v1546_v39 }
 0x103   :  { %1548 = vmatprep.subr.bf16.mxu1 %v1671_v3  ;;  %1570 = vmatprep.subr.bf16.mxu0 %v1569_v35 }
 0x104   :  { %1572 = vmatpush1.bf16.msra.mxu0 %v1571_v38 }
 0x105   :  { %1585 = vmatprep.subr.bf16.mxu0 %v1671_v3 }
 0x106   :  { %1550 = vmatpush3.bf16.msra.mxu1 %v1549_v41  ;;  %v1268_v41 = vld [vmem:[%s2346_s10] ss:$0 sm:$0xff] }
 0x107   :  { %1551 = vmatprep.subr.bf16.mxu1 %v1671_v3 }
 0x10a   :  { %1553 = vmatpush3.bf16.msra.mxu1 %v1552_v44 }
 0x10b   :  { %1554 = vmatprep.subr.bf16.mxu1 %v1671_v3 }
 0x10e   :  { %1556 = vmatpush3.bf16.msra.mxu1 %v1555_v55  ;;  %v696_v55 = vld [vmem:[%s2347_s13 + $0x18] sm:$0xff] }
 0x10f   :  { %1573 = vmatprep.subr.bf16.mxu1 %v1671_v3 }
 0x1d4   :  { %v336_v46 = vpop.f32.mrb[2].mxu1 }
 0x1d5   :  { %v2001_v48 = vadd.f32 %v1266_v45, %v336_v46  ;;  %v1428_v50 = vpop.f32.mrb[3].mxu1  ;;  %v2114_v45 = vld.sshfl [vmem:[%s2348_s2] sm:$0x33 pattern:$0x76325410]  ;;  %s1687_s2 = smov 12  }
 0x1d7   :  { %v340_v51 = vmul.f32 0.5, %v2001_v48  ;;  %v651_v10 = vmul.f32 1.442695, %v2001_v48  ;;  %v650_v20 = vmul.f32 %v2001_v48, %v2001_v48 }
 0x1d9   :  { %v341_v52 = vmul.f32 1.442695, %v340_v51 }
 0x1db   :  { %1657 = vpow2.f32 %v341_v52  ;;  %v1586_v52 = vpack.c.bf16 %v694_v43, %v693_v42 }
 0x1e5   :  { %v1658_v56 = vpop.eup %1657 }
 0x1e6   :  { %v343_v57 = vmul.f32 0.1, %v1658_v56  ;;  %v732_v56 = vcombine.high %v2114_v45, %v2114_v45 }
 0x1e8   :  { %346 = vrot.lane.b32.xlu0 %v343_v57, %s1674_s8 }
 0x25a   :  { %v347_v59 = vpop.permute.xlu0 %346 }
 0x25b   :  { %v349_v60 = vmul.f32 %v347_v59, %v344_v58  ;;  %v1589_v58 = vpack.c.bf16 %v696_v55, %v695_v54  ;;  %v697_v59 = vld [vmem:[%s2347_s13 + $0x20] sm:$0xff] }
 0x25d   :  { %v2016_v61 = vadd.f32 %v349_v60, %v2001_v48  ;;  %v698_v60 = vld [vmem:[%s2347_s13 + $0x28] sm:$0xff] }
 0x25f   :  { %1446 = vmatmul.mubr.msk.f32.vlgmr.msra.gmra.mrb[4].mxu1 %vm266_vm1, %v2016_v61  ;;  %v685_v62 = vmul.f32 %v2016_v61, %v2016_v61 }
 0x260   :  { %1464 = vmatprep.mubr.msk.f32.mxu1 %vm1672_vm0, %v1673_v4  ;;  %1575 = vmatpush3.bf16.msra.mxu1 %v1574_v5  ;;  %v1598_v5 = vpack.c.bf16 %v702_v2, %v701_v1 }
 0x261   :  { %v686_v63 = vsel %vm669_vm2, %v685_v62, 0.0  ;;  %1576 = vmatprep.subr.bf16.mxu1 %v1671_v3  ;;  %v699_v62 = vld [vmem:[%s2347_s13 + $0x30] sm:$0xff] }
 0x262   :  { %687 = vadd.xlane.f32.xlu0 %v686_v63  ;;  %v700_v63 = vld [vmem:[%s2347_s13 + $0x38] sm:$0xff] }
 0x263   :  { %v1595_v0 = vpack.c.bf16 %v700_v63, %v699_v62 }
 0x264   :  { %1578 = vmatpush3.bf16.msra.mxu1 %v1577_v13  ;;  %v708_v13 = vld [vmem:[%s2347_s13 + $0x78] sm:$0xff] }
 0x265   :  { %1579 = vmatprep.subr.bf16.mxu1 %v1671_v3  ;;  %v1607_v14 = vpack.c.bf16 %v708_v13, %v707_v12 }
 0x268   :  { %1581 = vmatpush3.bf16.msra.mxu1 %v1580_v28  ;;  %v466_v28 = vlaneseq }
 0x269   :  { %1582 = vmatprep.subr.bf16.mxu1 %v1671_v3 }
 0x26a   :  { %v2204_v29 = vshrl.u32 %v466_v28, 7  ;;  %v2227_v12 = vand.u32 127, %v466_v28 }
 0x26c   :  { %1584 = vmatpush3.bf16.msra.mxu1 %v1583_v32  ;;  %v468_v30 = vsub.s32 0, %v2204_v29  ;;  %v476_v31 = vsub.s32 2, %v2204_v29  ;;  %v464_v32 = vld [vmem:[%s2349_s12] sm:$0x7]  ;;  %v472_v33 = vsub.s32 1, %v2204_v29  ;;  %vm906_vm6 = vcmp.le.s32.totalorder %v2204_v29, %v2227_v12 }
 0x26d   :  { %1467 = vmatprep.subr.mxu1 %v1673_v4  ;;  %v1277_v13 = vsel %vm906_vm6, 1.0, %v1673_v4 }
 0x26e   :  { %v469_v34 = vrot.slane %v464_v32, %v468_v30  ;;  %v477_v35 = vrot.slane %v464_v32, %v476_v31  ;;  %v473_v36 = vrot.slane %v464_v32, %v472_v33  ;;  %v649_v30 = vadd.f32 5.6051702, %v2001_v48  ;;  %v987_v33 = vld [vmem:[%s2351_s3] sm:$0x3]  ;;  %s1681_s3 = smov 8  }
 0x2ef   :  { %v688_v39 = vpop.xlane.xlu0 %687 }
 0x2f0   :  { %v689_v40 = vmax.f32 %v688_v39, 1e-24 }
 0x2f2   :  { %1659 = vrsqrt.f32 %v689_v40 }
 0x2fc   :  { %v1660_v46 = vpop.eup %1659 }
 0x2fd   :  { %v691_v57 = vmul.f32 %v1660_v46, %v2016_v61  ;;  %v1592_v61 = vpack.c.bf16 %v698_v60, %v697_v59 }
 0x332   :  { %v435_v44 = vpop.f32.mrb[4].mxu1 }
 0x333   :  { %v436_v50 = vadd.f32 %v1268_v41, %v435_v44  ;;  %v1447_v51 = vpop.f32.mrb[5].mxu1 }
 0x335   :  { %v439_v53 = vmax.f32 %v436_v50, 0.0 }
 0x337   :  { %1270 = vmatmul.mubr.msk.f32.vlgmr.msra.gmra.mrb[2].mxu0 %vm266_vm1, %v439_v53  ;;  %1465 = vmatmul.mubr.msk.f32.vlgmr.msra.gmra.mrb[6].mxu1 %vm266_vm1, %v439_v53 }
 0x338   :  { %1587 = vmatpush1.bf16.msra.mxu0 %v1586_v52  ;;  %1468 = vmatpush3.xpose.msk.msra.mxu1 %vm266_vm1, %v691_v57 }
 0x339   :  { %1588 = vmatprep.subr.bf16.mxu0 %v1671_v3  ;;  %1274 = vmatprep.mubr.msk.f32.mxu0 %vm266_vm1, %v732_v56 }
 0x33a   :  { %1469 = vmatprep.mubr.msk.f32.mxu1 %vm1672_vm0, %v1673_v4  ;;  %1472 = vmatprep.subr.mxu1 %v1673_v4 }
 0x33c   :  { %1590 = vmatpush1.bf16.msra.mxu0 %v1589_v58 }
 0x33d   :  { %1591 = vmatprep.subr.bf16.mxu0 %v1671_v3 }
 0x340   :  { %1593 = vmatpush1.bf16.msra.mxu0 %v1592_v61 }
 0x341   :  { %1594 = vmatprep.subr.bf16.mxu0 %v1671_v3 }
 0x344   :  { %1596 = vmatpush1.bf16.msra.mxu0 %v1595_v0 }
 0x345   :  { %1597 = vmatprep.subr.bf16.mxu0 %v1671_v3 }
 0x348   :  { %1599 = vmatpush1.bf16.msra.mxu0 %v1598_v5 }
 0x349   :  { %1600 = vmatprep.subr.bf16.mxu0 %v1671_v3 }
 0x34c   :  { %1602 = vmatpush1.bf16.msra.mxu0 %v1601_v8 }
 0x34d   :  { %1603 = vmatprep.subr.bf16.mxu0 %v1671_v3 }
 0x350   :  { %1605 = vmatpush1.bf16.msra.mxu0 %v1604_v11 }
 0x351   :  { %1606 = vmatprep.subr.bf16.mxu0 %v1671_v3 }
 0x354   :  { %1608 = vmatpush1.bf16.msra.mxu0 %v1607_v14 }
 0x355   :  { %1609 = vmatprep.subr.bf16.mxu0 %v1671_v3 }
 0x358   :  { %1611 = vmatpush1.bf16.msra.mxu0 %v1610_v18 }
 0x359   :  { %1612 = vmatprep.subr.bf16.mxu0 %v1671_v3 }
 0x35c   :  { %1614 = vmatpush1.bf16.msra.mxu0 %v1613_v21 }
 0x35d   :  { %1615 = vmatprep.subr.bf16.mxu0 %v1671_v3 }
 0x360   :  { %1617 = vmatpush1.bf16.msra.mxu0 %v1616_v24 }
 0x361   :  { %1618 = vmatprep.subr.bf16.mxu0 %v1671_v3 }
 0x364   :  { %1620 = vmatpush1.bf16.msra.mxu0 %v1619_v27 }
 0x367   :  { %801 = vmatmul.mubr.f32.vlgmr.msra.gmra.mrb[4].mxu0 %v2114_v45 }
 0x40a   :  { %v550_v3 = vpop.f32.mrb[2].mxu0  ;;  %v621_v37 = vpop.f32.mrb[6].mxu1 }
 0x40b   :  { %v551_v38 = vadd.f32 %v550_v3, %v469_v34  ;;  %v622_v39 = vadd.f32 %v621_v37, %v477_v35  ;;  %v552_v40 = vpop.f32.mrb[3].mxu0  ;;  %v1466_v41 = vpop.f32.mrb[7].mxu1  ;;  %v1676_v34 = vmov 3   ;;  %v2255_v37 = vld [vmem:[%s2352_s4] sm:$0x3]  ;;  %s1682_s4 = smov 9  }
 0x40c   :  { %v553_v42 = vadd.f32 %v552_v40, %v473_v36  ;;  %vm988_vm8 = vcmp.ge.s32.totalorder %v2255_v37, 1  ;;  %vm1025_vm9 = vcmp.ge.s32.totalorder %v2255_v37, 2  ;;  %vm1061_vm11 = vcmp.ge.s32.totalorder %v2255_v37, 3 }
 0x40d   :  { %v625_v43 = vsub.f32 %v551_v38, %v1873_v47  ;;  %v627_v44 = vsub.f32 %v622_v39, %v1941_v16  ;;  %v1272_v47 = vld [vmem:[%s2350_s14] ss:$0 sm:$0xff]  ;;  %v1281_v38 = vsel %vm988_vm8, 1.0, %v1673_v4  ;;  %v1283_v39 = vsel %vm1025_vm9, 1.0, %v1673_v4 }
 0x40e   :  { %v626_v45 = vsub.f32 %v553_v42, %v1877_v49  ;;  %v1644_v40 = vpack.i.bf16 %v1283_v39, %v1281_v38  ;;  %vm1133_vm14 = vcmp.ge.s32.totalorder %v2255_v37, 5  ;;  %vm1097_vm15 = vcmp.ge.s32.totalorder %v2255_v37, 4 }
 0x40f   :  { %v628_v46 = vmul.f32 %v625_v43, %v625_v43  ;;  %v630_v50 = vmul.f32 %v627_v44, %v627_v44  ;;  %vm1169_vm6 = vcmp.ge.s32.totalorder %v2255_v37, 6 }
 0x410   :  { %v629_v51 = vmul.f32 %v626_v45, %v626_v45  ;;  %v1677_v45 = vmov 1  }
 0x411   :  { %v632_v52 = vsel %vm631_vm3, %v628_v46, 0.0  ;;  %v635_v55 = vsel %vm631_vm3, %v630_v50, 0.0  ;;  %v1678_v50 = vmov 2  }
 0x412   :  { %v633_v53 = vsel %vm631_vm3, %v629_v51, 0.0  ;;  %v1679_v51 = vmov 4  }
 0x413   :  { %v634_v54 = vadd.f32 %v633_v53, %v632_v52  ;;  %v1680_v52 = vmov 5   ;;  %v1285_v53 = vsel %vm1061_vm11, 1.0, %v1673_v4 }
 0x415   :  { %v636_v56 = vadd.f32 %v635_v55, %v634_v54 }
 0x43a   :  { %v802_v57 = vpop.f32.mrb[4].mxu0 }
 0x43b   :  { %v803_v16 = vadd.f32 %v1272_v47, %v802_v57  ;;  %v804_v58 = vpop.f32.mrb[5].mxu0 }
 0x43d   :  { %v806_v49 = vmul.f32 %v803_v16, %v803_v16 }
 0x43f   :  { %v808_v59 = vsel %vm807_vm4, %v806_v49, 0.0 }
 0x440   :  { %809 = vadd.xlane.f32.xlu1 %v808_v59 }
 0x4cd   :  { %v810_v60 = vpop.xlane.xlu1 %809 }
 0x4ce   :  { %v811_v61 = vmax.f32 %v810_v60, 1e-24 }
 0x4d0   :  { %1661 = vrsqrt.f32 %v811_v61 }
 0x4da   :  { %v1662_v62 = vpop.eup %1661 }
 0x4db   :  { %v813_v63 = vmul.f32 %v1662_v62, %v803_v16 }
 0x4dd   :  { %1470 = vmatmul.mubr.msk.f32.vlgmr.msra.gmra.mrb[8].mxu1 %vm266_vm1, %v813_v63 }
 0x4de   :  { %1474 = vmatprep.mubr.msk.f32.mxu1 %vm1672_vm0, %v1673_v4  ;;  %1473 = vmatpush3.msk.msra.mxu1 %vm631_vm3, %v1277_v13  ;;  %v1287_v13 = vsel %vm1097_vm15, 1.0, %v1673_v4 }
 0x5b0   :  { %v886_v0 = vpop.f32.mrb[8].mxu1 }
 0x5b1   :  { %v1471_v1 = vpop.f32.mrb[9].mxu1  ;;  %v891_v2 = vsel %vm890_vm5, %v886_v0, -inf }
 0x5b2   :  { %892 = vmax.xlane.f32.xlu1 %v891_v2 }
 0x63f   :  { %v893_v5 = vpop.xlane.xlu1 %892 }
 0x640   :  { %v894_v6 = vsub.f32 %v886_v0, %v893_v5 }
 0x642   :  { %v895_v7 = vmul.f32 1.442695, %v894_v6 }
 0x644   :  { %1663 = vpow2.f32 %v895_v7 }
 0x645   :  { %1665 = vpow2.f32 %v651_v10 }
 0x64e   :  { %v1664_v8 = vpop.eup %1663 }
 0x64f   :  { %v897_v9 = vsel %vm890_vm5, %v1664_v8, 0.0  ;;  %v1666_v11 = vpop.eup %1665 }
 0x650   :  { %898 = vadd.xlane.f32.xlu1 %v897_v9 }
 0x654   :  { %637 = vadd.xlane.f32.xlu1 %v636_v56 }
 0x665   :  { %654 = vrot.lane.b32.xlu1 %v1666_v11, %s1674_s8  ;;  %v1289_v11 = vsel %vm1133_vm14, 1.0, %v1673_v4 }
 0x6dd   :  { %v899_v14 = vpop.xlane.xlu1 %898 }
 0x6de   :  { %1667 = vrcp.f32 %v899_v14 }
 0x6e1   :  { %v638_v17 = vpop.xlane.xlu1 %637 }
 0x6e2   :  { %v639_v18 = vrot.slane %v638_v17, 4 }
 0x6e4   :  { %v640_v19 = vadd.f32 %v639_v18, %v638_v17 }
 0x6e5   :  { %v655_v21 = vpop.permute.xlu1 %654 }
 0x6e6   :  { %v641_v22 = vrot.slane %v640_v19, 2  ;;  %v657_v23 = vadd.f32 %v655_v21, %v650_v20 }
 0x6e8   :  { %v1668_v24 = vpop.eup %1667  ;;  %v659_v25 = vmul.f32 100.0, %v657_v23  ;;  %v642_v26 = vadd.f32 %v641_v22, %v640_v19 }
 0x6e9   :  { %v2238_v27 = vmul.f32 %v1668_v24, %v1664_v8 }
 0x6ea   :  { %661 = vrot.lane.b32.xlu1 %v659_v25, %s1674_s8  ;;  %v643_v28 = vrot.slane %v642_v26, 1 }
 0x6eb   :  { %1475 = vmatmul.mubr.msk.f32.vlgmr.msra.gmra.mrb[10].mxu1 %vm909_vm7, %v2238_v27  ;;  %1669 = vlog2.f32 %v2238_v27 }
 0x6ec   :  { %v644_v29 = vadd.f32 %v643_v28, %v642_v26 }
 0x6ee   :  { %1621 = vpush %v644_v29 }
 0x71f   :  { %s1622_s25 = spop %1621 }
 0x75c   :  { %v662_v31 = vpop.permute.xlu1 %661 }
 0x75d   :  { %v664_v32 = vsub.f32 %v649_v30, %v662_v31 }
 0x75f   :  { %666 = vrot.lane.b32.xlu0 %v664_v32, %s1674_s8  ;;  %s1683_s8 = smov 10  }
 0x763   :  { %991 = vperm.xlu0 %1642, %v987_v33  }
 0x767   :  { %1651 = vset.pattern.permute.xlu0 %v1676_v34 }
 0x768   :  { %1099 = vperm.xlu0 %1651, %v987_v33  }
 0x76c   :  { %1655 = vset.pattern.permute.xlu0 %v1675_v15 }
 0x7be   :  { %v2249_v35 = vpop.f32.mrb[10].mxu1 }
 0x7bf   :  { %v1476_v36 = vpop.f32.mrb[11].mxu1 }
 0x7d1   :  { %v667_v3 = vpop.permute.xlu0 %666 }
 0x7d2   :  { %v670_v48 = vsel %vm669_vm2, %v667_v3, 0.0 }
 0x7d3   :  { %671 = vadd.xlane.f32.xlu1 %v670_v48 }
 0x7e2   :  { %v992_v41 = vpop.permute.xlu0 %991 }
 0x7e3   :  { %vm994_vm10 = vcmp.le.f32.partialorder %v2249_v35, %v992_v41 }
 0x7e4   :  { %v995_v42 = vsel %vm994_vm10, 1, %v1675_v15  ;;  %1645 = vperm.xlu1 %1643, %v1644_v40  }
 0x7e5   :  { %v996_v43 = vsel %vm890_vm5, %v995_v42, 0 }
 0x7e6   :  { %v997_v44 = vand.u32 65535, %v996_v43  ;;  %v998_v54 = vshrl.u32 %v996_v43, 16 }
 0x7e7   :  { %v1100_v14 = vpop.permute.xlu0 %1099 }
 0x7e8   :  { %1649 = vset.pattern.permute.xlu1 %v1677_v45  ;;  %v999_v46 = vcvt.s32.f32 %v997_v44  ;;  %v1000_v55 = vcvt.s32.f32 %v998_v54  ;;  %vm1102_vm0 = vcmp.le.f32.partialorder %v2249_v35, %v1100_v14  ;;  %v1291_v54 = vsel %vm1169_vm6, 1.0, %v1673_v4 }
 0x7e9   :  { %1027 = vperm.xlu1 %1649, %v987_v33   ;;  %v1103_v17 = vsel %vm1102_vm0, 1, %v1675_v15 }
 0x7ea   :  { %1001 = vadd.xlane.f32.xlu0 %v999_v46  ;;  %v1104_v20 = vsel %vm890_vm5, %v1103_v17, 0 }
 0x7eb   :  { %v1106_v22 = vshrl.u32 %v1104_v20, 16  ;;  %v1105_v26 = vand.u32 65535, %v1104_v20 }
 0x7ed   :  { %1650 = vset.pattern.permute.xlu1 %v1678_v50  ;;  %v1108_v25 = vcvt.s32.f32 %v1106_v22  ;;  %v1107_v30 = vcvt.s32.f32 %v1105_v26 }
 0x7ee   :  { %1063 = vperm.xlu1 %1650, %v987_v33  }
 0x7f2   :  { %1652 = vset.pattern.permute.xlu1 %v1679_v51 }
 0x7f3   :  { %1135 = vperm.xlu1 %1652, %v987_v33  }
 0x7f7   :  { %1653 = vset.pattern.permute.xlu1 %v1680_v52 }
 0x7f8   :  { %1171 = vperm.xlu1 %1653, %v987_v33  }
 0x7fc   :  { %1654 = vset.pattern.permute.xlu1 %v1675_v15 }
 0x7fd   :  { %1090 = vperm.xlu1 %1654, %v1285_v53  }
 0x821   :  { %1003 = vadd.xlane.f32.xlu1 %v1000_v55 }
 0x860   :  { %v672_v56 = vpop.xlane.xlu1 %671 }
 0x861   :  { %v673_v47 = vrot.slane %v672_v56, 4 }
 0x863   :  { %v674_v57 = vadd.f32 %v673_v47, %v672_v56 }
 0x864   :  { %v2273_v16 = vpop.permute.xlu1 %1645 }
 0x865   :  { %v675_v58 = vrot.slane %v674_v57, 2 }
 0x867   :  { %v676_v49 = vadd.f32 %v675_v58, %v674_v57 }
 0x868   :  { %v1028_v59 = vpop.permute.xlu1 %1027 }
 0x869   :  { %vm1030_vm12 = vcmp.le.f32.partialorder %v2249_v35, %v1028_v59  ;;  %v677_v60 = vrot.slane %v676_v49, 1 }
 0x86a   :  { %v1031_v61 = vsel %vm1030_vm12, 1, %v1675_v15 }
 0x86b   :  { %v1032_v62 = vsel %vm890_vm5, %v1031_v61, 0  ;;  %v678_v63 = vadd.f32 %v677_v60, %v676_v49  ;;  %v1648_v60 = vunpack.i.h.bf16 %v2273_v16 }
 0x86c   :  { %v1034_v0 = vshrl.u32 %v1032_v62, 16  ;;  %v1033_v1 = vand.u32 65535, %v1032_v62 }
 0x86d   :  { %1623 = vpush %v678_v63  ;;  %v1064_v2 = vpop.permute.xlu1 %1063 }
 0x86e   :  { %vm1066_vm13 = vcmp.le.f32.partialorder %v2249_v35, %v1064_v2  ;;  %v1036_v5 = vcvt.s32.f32 %v1034_v0  ;;  %v1035_v6 = vcvt.s32.f32 %v1033_v1 }
 0x86f   :  { %v1067_v7 = vsel %vm1066_vm13, 1, %v1675_v15 }
 0x870   :  { %v1068_v8 = vsel %vm890_vm5, %v1067_v7, 0  ;;  %1039 = vadd.xlane.f32.xlu1 %v1036_v5  ;;  %1037 = vadd.xlane.f32.xlu0 %v1035_v6 }
 0x871   :  { %v1070_v9 = vshrl.u32 %v1068_v8, 16  ;;  %v1069_v19 = vand.u32 65535, %v1068_v8 }
 0x872   :  { %v1136_v18 = vpop.permute.xlu1 %1135 }
 0x873   :  { %v1072_v10 = vcvt.s32.f32 %v1070_v9  ;;  %vm1138_vm1 = vcmp.le.f32.partialorder %v2249_v35, %v1136_v18  ;;  %v1071_v21 = vcvt.s32.f32 %v1069_v19 }
 0x874   :  { %v1139_v24 = vsel %vm1138_vm1, 1, %v1675_v15 }
 0x875   :  { %1075 = vadd.xlane.f32.xlu0 %v1072_v10  ;;  %v1140_v28 = vsel %vm890_vm5, %v1139_v24, 0 }
 0x876   :  { %v1142_v31 = vshrl.u32 %v1140_v28, 16  ;;  %v1141_v48 = vand.u32 65535, %v1140_v28 }
 0x877   :  { %v1172_v23 = vpop.permute.xlu1 %1171  ;;  %v1002_v33 = vpop.xlane.xlu0 %1001 }
 0x878   :  { %vm1174_vm2 = vcmp.le.f32.partialorder %v2249_v35, %v1172_v23  ;;  %v1144_v3 = vcvt.s32.f32 %v1142_v31  ;;  %v1005_v39 = vcvt.f32.s32 %v1002_v33  ;;  %v1143_v42 = vcvt.s32.f32 %v1141_v48 }
 0x879   :  { %v1175_v32 = vsel %vm1174_vm2, 1, %v1675_v15  ;;  %v1647_v35 = vunpack.i.l.bf16 %v2273_v16 }
 0x87a   :  { %v1176_v38 = vsel %vm890_vm5, %v1175_v32, 0 }
 0x87b   :  { %v1178_v43 = vshrl.u32 %v1176_v38, 16  ;;  %v1177_v46 = vand.u32 65535, %v1176_v38 }
 0x87c   :  { %v2295_v29 = vpop.permute.xlu1 %1090 }
 0x87d   :  { %v1180_v15 = vcvt.s32.f32 %v1178_v43  ;;  %v1179_v53 = vcvt.s32.f32 %v1177_v46 }
 0x881   :  { %1162 = vperm.xlu1 %1654, %v1289_v11  }
 0x88b   :  { %1126 = vperm.xlu0 %1655, %v1287_v13  }
 0x89e   :  { %s1624_s26 = spop %1623 }
 0x8a5   :  { %1073 = vadd.xlane.f32.xlu1 %v1071_v21 }
 0x8a9   :  { %1111 = vadd.xlane.f32.xlu1 %v1108_v25 }
 0x8ad   :  { %1109 = vadd.xlane.f32.xlu1 %v1107_v30 }
 0x8ae   :  { %v1004_v34 = vpop.xlane.xlu1 %1003 }
 0x8af   :  { %v1006_v36 = vcvt.f32.s32 %v1004_v34 }
 0x8b1   :  { %v1007_v40 = vshll.u32 %v1006_v36, 16  ;;  %1147 = vadd.xlane.f32.xlu1 %v1144_v3 }
 0x8b3   :  { %v1008_v41 = vadd.s32 %v1007_v40, %v1005_v39 }
 0x8b5   :  { %vm1009_vm3 = vcmp.lt.s32.totalorder %v1008_v41, 3  ;;  %1145 = vadd.xlane.f32.xlu1 %v1143_v42 }
 0x8b6   :  { %v1010_v44 = vsel %vm1009_vm3, %v1008_v41, 3 }
 0x8b7   :  { %vm1011_vm4 = vcmp.eq.s32.totalorder %v2227_v12, %v1010_v44  ;;  %v1023_v45 = vsel %vm988_vm8, %v1010_v44, 4294967295 }
 0x8b8   :  { %v1280_v50 = vsel %vm1011_vm4, 1.0, %v1673_v4  ;;  %v1024_v51 = vcvt.s32.f32 %v1023_v45 }
 0x8b9   :  { %v1021_v52 = vmul.f32 %v1647_v35, %v1280_v50  ;;  %1183 = vadd.xlane.f32.xlu1 %v1180_v15 }
 0x8ba   :  { %1218 = vrot.lane.b32.xlu0 %v1024_v51, %s1681_s3  ;;  %v1670_v51 = vpop.eup %1669 }
 0x8bd   :  { %1181 = vadd.xlane.f32.xlu1 %v1179_v53 }
 0x8ce   :  { %1198 = vperm.xlu1 %1654, %v1291_v54  }
 0x8fd   :  { %v1040_v55 = vpop.xlane.xlu1 %1039  ;;  %v1038_v56 = vpop.xlane.xlu0 %1037 }
 0x8fe   :  { %v1042_v47 = vcvt.f32.s32 %v1040_v55  ;;  %v1041_v58 = vcvt.f32.s32 %v1038_v56  ;;  %v1207_v55 = vmul.f32 0.6931472, %v1670_v51 }
 0x900   :  { %v1043_v57 = vshll.u32 %v1042_v47, 16 }
 0x901   :  { %v1163_v5 = vpop.permute.xlu1 %1162 }
 0x902   :  { %v1044_v49 = vadd.s32 %v1043_v57, %v1041_v58  ;;  %v1076_v2 = vpop.xlane.xlu0 %1075 }
 0x903   :  { %v1078_v6 = vcvt.f32.s32 %v1076_v2 }
 0x904   :  { %vm1045_vm8 = vcmp.lt.s32.totalorder %v1044_v49, 3 }
 0x905   :  { %v1046_v59 = vsel %vm1045_vm8, %v1044_v49, 3  ;;  %v1079_v8 = vshll.u32 %v1078_v6, 16  ;;  %vm1250_vm8 = vcmask 97280  }
 0x906   :  { %vm1047_vm10 = vcmp.eq.s32.totalorder %v2227_v12, %v1046_v59  ;;  %v1059_v61 = vsel %vm1025_vm9, %v1046_v59, 4294967295 }
 0x907   :  { %v1282_v62 = vsel %vm1047_vm10, 1.0, %v1673_v4  ;;  %v1060_v63 = vcvt.s32.f32 %v1059_v61  ;;  %vm1252_vm10 = vcmask 105472  }
 0x908   :  { %v1057_v0 = vmul.f32 %v1648_v60, %v1282_v62 }
 0x909   :  { %1222 = vrot.lane.b32.xlu0 %v1060_v63, %s1682_s4 }
 0x90a   :  { %v1058_v1 = vadd.f32 %v1057_v0, %v1021_v52  ;;  %v1127_v40 = vpop.permute.xlu0 %1126 }
 0x92c   :  { %v1219_v60 = vpop.permute.xlu0 %1218 }
 0x932   :  { %v1074_v7 = vpop.xlane.xlu1 %1073 }
 0x933   :  { %v1077_v9 = vcvt.f32.s32 %v1074_v7 }
 0x935   :  { %v1080_v10 = vadd.s32 %v1079_v8, %v1077_v9  ;;  %v646_v8 = vstv %s1622_s25 }
 0x936   :  { %v1112_v16 = vpop.xlane.xlu1 %1111 }
 0x937   :  { %vm1081_vm12 = vcmp.lt.s32.totalorder %v1080_v10, 3  ;;  %v1114_v11 = vcvt.f32.s32 %v1112_v16  ;;  %v648_v16 = vmul.f32 0.0006510417, %v646_v8 }
 0x938   :  { %v1082_v13 = vsel %vm1081_vm12, %v1080_v10, 3  ;;  %vm1254_vm12 = vcmask 113664  }
 0x939   :  { %v1095_v14 = vsel %vm1061_vm11, %v1082_v13, 4294967295  ;;  %v1115_v19 = vshll.u32 %v1114_v11, 16  ;;  %vm1083_vm13 = vcmp.eq.s32.totalorder %v2227_v12, %v1082_v13 }
 0x93a   :  { %v1110_v17 = vpop.xlane.xlu1 %1109  ;;  %v1096_v18 = vcvt.s32.f32 %v1095_v14  ;;  %v1284_v33 = vsel %vm1083_vm13, 1.0, %v1673_v4 }
 0x93b   :  { %v1113_v20 = vcvt.f32.s32 %v1110_v17  ;;  %v1093_v48 = vmul.f32 %v1284_v33, %v2295_v29 }
 0x93c   :  { %1226 = vrot.lane.b32.xlu0 %v1096_v18, %s1683_s8 }
 0x93d   :  { %v1116_v21 = vadd.s32 %v1115_v19, %v1113_v20  ;;  %v1094_v44 = vadd.f32 %v1093_v48, %v1058_v1  ;;  %v680_v1 = vstv %s1624_s26 }
 0x93e   :  { %v1148_v22 = vpop.xlane.xlu1 %1147 }
 0x93f   :  { %v1150_v23 = vcvt.f32.s32 %v1148_v22  ;;  %vm1117_vm9 = vcmp.lt.s32.totalorder %v1116_v21, 3 }
 0x940   :  { %v1118_v28 = vsel %vm1117_vm9, %v1116_v21, 3  ;;  %vm1258_vm9 = vcmask 130048  }
 0x941   :  { %v1151_v25 = vshll.u32 %v1150_v23, 16  ;;  %vm1119_vm11 = vcmp.eq.s32.totalorder %v2227_v12, %v1118_v28  ;;  %v1131_v54 = vsel %vm1097_vm15, %v1118_v28, 4294967295  ;;  %vm1242_vm15 = vcmask 64512  }
 0x942   :  { %v1146_v24 = vpop.xlane.xlu1 %1145  ;;  %v1286_v36 = vsel %vm1119_vm11, 1.0, %v1673_v4  ;;  %v1132_v47 = vcvt.s32.f32 %v1131_v54 }
 0x943   :  { %v1149_v26 = vcvt.f32.s32 %v1146_v24  ;;  %v1129_v42 = vmul.f32 %v1286_v36, %v1127_v40 }
 0x945   :  { %v1152_v30 = vadd.s32 %v1151_v25, %v1149_v26  ;;  %v1130_v45 = vadd.f32 %v1129_v42, %v1094_v44 }
 0x946   :  { %v1184_v31 = vpop.xlane.xlu1 %1183 }
 0x947   :  { %vm1153_vm0 = vcmp.lt.s32.totalorder %v1152_v30, 3  ;;  %v1186_v32 = vcvt.f32.s32 %v1184_v31 }
 0x948   :  { %v1154_v34 = vsel %vm1153_vm0, %v1152_v30, 3 }
 0x949   :  { %vm1155_vm1 = vcmp.eq.s32.totalorder %v2227_v12, %v1154_v34  ;;  %v1187_v38 = vshll.u32 %v1186_v32, 16  ;;  %v1167_v49 = vsel %vm1133_vm14, %v1154_v34, 4294967295  ;;  %vm1248_vm14 = vcmask 89088  }
 0x94a   :  { %v1182_v3 = vpop.xlane.xlu1 %1181  ;;  %v1288_v41 = vsel %vm1155_vm1, 1.0, %v1673_v4  ;;  %v1168_v59 = vcvt.s32.f32 %v1167_v49 }
 0x94b   :  { %v1185_v39 = vcvt.f32.s32 %v1182_v3  ;;  %v1165_v35 = vmul.f32 %v1288_v41, %v1163_v5  ;;  %v682_v5 = vmul.f32 0.00390625, %v680_v1 }
 0x94d   :  { %v1188_v43 = vadd.s32 %v1187_v38, %v1185_v39  ;;  %v1166_v52 = vadd.f32 %v1165_v35, %v1130_v45  ;;  %v683_v10 = vmul.f32 -0.5, %v682_v5 }
 0x94e   :  { %v1199_v50 = vpop.permute.xlu1 %1198 }
 0x94f   :  { %vm1189_vm2 = vcmp.lt.s32.totalorder %v1188_v43, 3  ;;  %v684_v17 = vadd.f32 %v683_v10, %v648_v16 }
 0x950   :  { %v1190_v15 = vsel %vm1189_vm2, %v1188_v43, 3 }
 0x951   :  { %vm1191_vm3 = vcmp.eq.s32.totalorder %v2227_v12, %v1190_v15  ;;  %v1203_v12 = vsel %vm1169_vm6, %v1190_v15, 4294967295  ;;  %vm1246_vm6 = vcmask 80896  }
 0x952   :  { %v1290_v46 = vsel %vm1191_vm3, 1.0, %v1673_v4  ;;  %v1204_v58 = vcvt.s32.f32 %v1203_v12 }
 0x953   :  { %v1201_v29 = vmul.f32 %v1290_v46, %v1199_v50 }
 0x955   :  { %v1202_v53 = vadd.f32 %v1201_v29, %v1166_v52 }
 0x957   :  { %1214 = vrot.lane.b32.xlu0 %v1202_v53, %s1684_s22  ;;  %vm1205_vm4 = vcmp.gt.f32.partialorder %v1202_v53, 0.0 }
 0x958   :  { %v1208_v56 = vsel %vm1205_vm4, %v1207_v55, 0.0 }
 0x959   :  { %v1209_v57 = vmul.f32 %v1208_v56, %v1202_v53 }
 0x95b   :  { %1230 = vrot.lane.b32.xlu0 %v1132_v47, %s1685_s23  ;;  %v1210_v4 = vsel %vm890_vm5, %v1209_v57, 0.0  ;;  %vm1244_vm5 = vcmask 72704  }
 0x95c   :  { %1211 = vadd.xlane.f32.xlu1 %v1210_v4 }
 0x95f   :  { %1238 = vrot.lane.b32.xlu0 %v1204_v58, %s1686_s24 }
 0x96d   :  { %1234 = vrot.lane.b32.xlu1 %v1168_v59, %s1687_s2 }
 0x97b   :  { %v1223_v61 = vpop.permute.xlu0 %1222 }
 0x9ae   :  { %v1227_v62 = vpop.permute.xlu0 %1226 }
 0x9c9   :  { %v1215_v63 = vpop.permute.xlu0 %1214 }
 0x9ca   :  { %v1241_v0 = vsel %vm909_vm7, %v2238_v27, %v1215_v63  ;;  %vm1256_vm7 = vcmask 121856  }
 0x9cb   :  { %v1243_v2 = vsel %vm1242_vm15, %v1241_v0, %v1219_v60 }
 0x9cc   :  { %v1245_v6 = vsel %vm1244_vm5, %v1243_v2, %v1223_v61 }
 0x9cd   :  { %v1231_v37 = vpop.permute.xlu0 %1230  ;;  %v1247_v9 = vsel %vm1246_vm6, %v1245_v6, %v1227_v62 }
 0x9ce   :  { %v1249_v11 = vsel %vm1248_vm14, %v1247_v9, %v1231_v37 }
 0x9d1   :  { %v1239_v14 = vpop.permute.xlu0 %1238 }
 0x9e9   :  { %v1212_v7 = vpop.xlane.xlu1 %1211 }
 0x9ed   :  { %v1235_v13 = vpop.permute.xlu1 %1234 }
 0x9ee   :  { %v1251_v27 = vsel %vm1250_vm8, %v1249_v11, %v1235_v13 }
 0x9ef   :  { %v1253_v18 = vsel %vm1252_vm10, %v1251_v27, %v1239_v14 }
 0x9f0   :  { %v1255_v19 = vsel %vm1254_vm12, %v1253_v18, %v1212_v7 }
 0x9f1   :  { %v1257_v20 = vsel %vm1256_vm7, %v1255_v19, %v684_v17 }
 0x9f2   :  { %v1259_v21 = vsel %vm1258_vm9, %v1257_v20, 0.0 }
 0x9f3   :  { %1260 = vst [vmem:[%s2353_s15] sm:$0x3] %v1259_v21 }

</bundles_post_ra>
